<compile_context>
chip_gen: v7x
topology: tpu7x:2x2x1
jax: 0.10.0
libtpu: 0.0.40
codegen_flags: <defaults>
</compile_context>

<pallas_src>
import functools

import jax
import jax.numpy as jnp
import numpy as np
from jax import lax
from jax.experimental import pallas as pl
from jax.experimental.pallas import tpu as pltpu


def bilstm_crf_kernel(x_ref, slab_ref, out_ref, *,
                      T, D, H2, K, start_tag, end_tag,
                      off_wih_f, off_wih_b, off_whh, off_wtag,
                      off_trans, off_transt, off_misc, out_pad_rows):
    HB = 2 * H2                     # concatenated [fwd, bwd] state width (32)
    W = slab_ref.shape[1]           # slab lane width (128)

    # ---- one-shot loads from the packed parameter slab (static offsets) ---------
    wih_f = slab_ref[off_wih_f:off_wih_f + D, :]            # (D, W) fwd gate lanes
    wih_b = slab_ref[off_wih_b:off_wih_b + D, :]            # (D, W) bwd gate lanes
    whh = slab_ref[off_whh:off_whh + HB, :]                 # (HB, W) fused recurrence
    wtag = slab_ref[off_wtag:off_wtag + HB, :]              # (HB, W) lanes [0:K] valid
    trans = slab_ref[off_trans:off_trans + K, 0:K]          # (K, K)  trans[next, prev]
    transt = slab_ref[off_transt:off_transt + K, 0:K]       # (K, K)  trans.T
    bias = slab_ref[off_misc + 0:off_misc + 1, :]           # (1, W)  b_ih+b_hh, both dirs
    h_cat = slab_ref[off_misc + 1:off_misc + 2, 0:HB]       # (1, HB) [h0_fwd, h0_bwd]
    c_cat = slab_ref[off_misc + 2:off_misc + 3, 0:HB]       # (1, HB) [c0_fwd, c0_bwd]
    btag = slab_ref[off_misc + 3:off_misc + 4, :]           # (1, W)  lanes [0:K] valid

    # ---- hoisted input projections: two batched MXU passes, bias added once -----
    x = x_ref[...]                                                       # (T, D)
    xwf = jnp.dot(x, wih_f, preferred_element_type=jnp.float32) + bias   # (T, W)
    xwb = jnp.dot(x, wih_b, preferred_element_type=jnp.float32)          # (T, W)

    # ---- fused fwd+bwd recurrence: ONE (1,HB)@(HB,W) matmul per unrolled step ----
    hs = [None] * T
    for t in range(T):                      # static python int -> fully unrolled
        tb = T - 1 - t
        xw_t = xwf[t:t + 1, :] + xwb[tb:tb + 1, :]           # chain-independent
        gates = xw_t + jnp.dot(h_cat, whh, preferred_element_type=jnp.float32)
        act = jax.nn.sigmoid(gates)         # 1 EUP pass; g-gate pre-scaled by 2
        i_a = act[:, 0 * HB:1 * HB]
        f_a = act[:, 1 * HB:2 * HB]
        g_a = 2.0 * act[:, 2 * HB:3 * HB] - 1.0              # tanh(z)=2*sigmoid(2z)-1
        o_a = act[:, 3 * HB:4 * HB]
        c_cat = f_a * c_cat + i_a * g_a
        h_cat = o_a * jnp.tanh(c_cat)
        hs[t] = h_cat                       # = [h_fwd(t), h_bwd(T-1-t)], kept in vregs

    # ---- hidden2tag: re-pair halves per output time step, one MXU matmul --------
    lane_hb = lax.broadcasted_iota(jnp.int32, (1, HB), 1)
    fwd_lane = lane_hb < H2
    rows = [jnp.where(fwd_lane, hs[t], hs[T - 1 - t]) for t in range(T)]
    hfb = jnp.concatenate(rows, axis=0)                                  # (T, HB)
    feats_pad = jnp.dot(hfb, wtag, preferred_element_type=jnp.float32) + btag  # (T, W)

    # ---- Viterbi forward DP: orientation alternates row/col so there is no
    #      per-step transpose on the fv dependency chain. Argmax uses exact
    #      float equality against the reduced max (safe: max is one of the
    #      elements) with min-index tie break == np.argmax first occurrence.
    col_idx = lax.broadcasted_iota(jnp.int32, (K, K), 1).astype(jnp.float32)
    row_idx = lax.broadcasted_iota(jnp.int32, (K, K), 0).astype(jnp.float32)
    lane_k = lax.broadcasted_iota(jnp.int32, (1, K), 1).astype(jnp.float32)
    sub_k = lax.broadcasted_iota(jnp.int32, (K, 1), 0).astype(jnp.float32)
    KF = float(K)

    fv = jnp.where(lane_k == float(start_tag), 0.0, -10000.0).astype(jnp.float32)
    fv_is_row = True
    bps = [None] * T
    bp_is_row = [False] * T
    for t in range(T):
        if fv_is_row:
            m = fv + trans                                   # m[next, prev]
            vmax = jnp.max(m, axis=1, keepdims=True)         # (K, 1)
            bps[t] = jnp.min(jnp.where(m == vmax, col_idx, KF), axis=1, keepdims=True)
            bp_is_row[t] = False
            # feats column only depends on feats (not fv) -> off the serial chain
            fcol = feats_pad[t:t + 1, 0:K].reshape(K, 1)
            fv = vmax + fcol                                 # (K, 1)
            fv_is_row = False
        else:
            m = fv + transt                                  # m[prev, next]
            vmax = jnp.max(m, axis=0, keepdims=True)         # (1, K)
            bps[t] = jnp.min(jnp.where(m == vmax, row_idx, KF), axis=0, keepdims=True)
            bp_is_row[t] = True
            fv = vmax + feats_pad[t:t + 1, 0:K]              # (1, K)
            fv_is_row = True

    if fv_is_row:
        term = fv + trans[end_tag:end_tag + 1, :]            # (1, K)
        score = jnp.max(term, axis=1, keepdims=True)         # (1, 1)
        ptr = jnp.min(jnp.where(term == score, lane_k, KF), axis=1, keepdims=True)
    else:
        term = fv + transt[:, end_tag:end_tag + 1]           # (K, 1)
        score = jnp.max(term, axis=0, keepdims=True)
        ptr = jnp.min(jnp.where(term == score, sub_k, KF), axis=0, keepdims=True)

    # ---- in-kernel backpointer chase (vector select; no host round trip) --------
    def lookup(bp, is_row, p):
        if is_row:
            return jnp.sum(jnp.where(lane_k == p, bp, 0.0), axis=1, keepdims=True)
        return jnp.sum(jnp.where(sub_k == p, bp, 0.0), axis=0, keepdims=True)

    path_vals = [None] * T
    path_vals[T - 1] = ptr
    for t in range(T - 1, 0, -1):
        ptr = lookup(bps[t], bp_is_row[t], ptr)
        path_vals[t - 1] = ptr
    start_val = lookup(bps[0], bp_is_row[0], ptr)

    # ---- single lane-dense output slab: feats rows, then one "extras" row -------
    lane_w = lax.broadcasted_iota(jnp.int32, (1, W), 1)
    ex = jnp.zeros((1, W), jnp.float32)
    for t in range(T):
        ex = jnp.where(lane_w == t, path_vals[t], ex)        # path (exact small ints)
    ex = jnp.where(lane_w == T, score, ex)
    ex = jnp.where(lane_w == T + 1, start_val, ex)

    pieces = [feats_pad, ex]
    if out_pad_rows > 0:
        pieces.append(jnp.zeros((out_pad_rows, W), jnp.float32))
    out_ref[...] = jnp.concatenate(pieces, axis=0)


def bilstm_crf_forward(x, slab, meta, *, start_tag, end_tag):
    T, D = x.shape
    H2, K, W = meta["H2"], meta["K"], meta["slab_w"]
    out_rows = ((T + 1 + 7) // 8) * 8
    kernel = functools.partial(
        bilstm_crf_kernel, T=T, D=D, H2=H2, K=K,
        start_tag=start_tag, end_tag=end_tag,
        off_wih_f=meta["off_wih_f"], off_wih_b=meta["off_wih_b"],
        off_whh=meta["off_whh"], off_wtag=meta["off_wtag"],
        off_trans=meta["off_trans"], off_transt=meta["off_transt"],
        off_misc=meta["off_misc"], out_pad_rows=out_rows - T - 1)
    vmem = pl.BlockSpec(memory_space=pltpu.MemorySpace.VMEM)
    out = pl.pallas_call(
        kernel,
        out_shape=jax.ShapeDtypeStruct((out_rows, W), jnp.float32),
        in_specs=[vmem, vmem],
        out_specs=vmem,
    )(x, slab)
    feats = out[0:T, 0:K]
    path = jnp.round(out[T, 0:T]).astype(jnp.int32)
    score = out[T, T]
    start = jnp.round(out[T, T + 1]).astype(jnp.int32)
    return score, path, feats, start


def prepare_kernel_params(raw, *, D, H2, K):
    """PyTorch-layout params -> one packed (rows, 128) f32 slab + static offsets."""
    (w_ih_f, w_hh_f, b_ih_f, b_hh_f,
     w_ih_b, w_hh_b, b_ih_b, b_hh_b,
     w_tag, b_tag, trans, h0, c0) = [np.asarray(a, np.float32) for a in raw]
    HB = 2 * H2
    W = max(4 * HB, 128)

    def place_w(w_dir, lane_off):   # (4*H2, in) torch layout -> (in, W)
        out = np.zeros((w_dir.shape[1], W), np.float32)
        for g in range(4):
            out[:, g * HB + lane_off: g * HB + lane_off + H2] = \
                w_dir[g * H2:(g + 1) * H2, :].T
        return out

    def place_b(b, lane_off):
        out = np.zeros((1, W), np.float32)
        for g in range(4):
            out[0, g * HB + lane_off: g * HB + lane_off + H2] = b[g * H2:(g + 1) * H2]
        return out

    wih_f_p = place_w(w_ih_f, 0)                              # fwd gates: first half
    wih_b_p = place_w(w_ih_b, H2)                             # bwd gates: second half
    whh_big = np.concatenate([place_w(w_hh_f, 0), place_w(w_hh_b, H2)], axis=0)
    bias_all = place_b(b_ih_f + b_hh_f, 0) + place_b(b_ih_b + b_hh_b, H2)

    # tanh(z) = 2*sigmoid(2z) - 1 : pre-scale g-gate (index 2) columns by 2.
    gsl = slice(2 * HB, 3 * HB)
    for arr in (wih_f_p, wih_b_p, whh_big, bias_all):
        arr[:, gsl] *= 2.0

    wtag_pad = np.zeros((HB, W), np.float32)
    wtag_pad[0:H2, 0:K] = w_tag[:, 0:H2].T
    wtag_pad[H2:HB, 0:K] = w_tag[:, H2:HB].T
    btag_pad = np.zeros((1, W), np.float32)
    btag_pad[0, 0:K] = b_tag

    k8 = ((K + 7) // 8) * 8
    trans_pad = np.zeros((k8, W), np.float32)
    trans_pad[0:K, 0:K] = trans
    transt_pad = np.zeros((k8, W), np.float32)
    transt_pad[0:K, 0:K] = trans.T

    misc = np.zeros((8, W), np.float32)
    misc[0] = bias_all[0]
    misc[1, 0:H2] = h0[0].reshape(-1)
    misc[1, H2:HB] = h0[1].reshape(-1)
    misc[2, 0:H2] = c0[0].reshape(-1)
    misc[2, H2:HB] = c0[1].reshape(-1)
    misc[3] = btag_pad[0]

    blocks = [wih_f_p, wih_b_p, whh_big, wtag_pad, trans_pad, transt_pad, misc]
    names = ["off_wih_f", "off_wih_b", "off_whh", "off_wtag",
             "off_trans", "off_transt", "off_misc"]
    offs, r = {}, 0
    for name, blk in zip(names, blocks):
        offs[name] = r
        r += blk.shape[0]
    slab = np.concatenate(blocks, axis=0)
    if slab.shape[0] % 8:
        slab = np.concatenate(
            [slab, np.zeros((8 - slab.shape[0] % 8, W), np.float32)], axis=0)
    meta = dict(D=D, H2=H2, K=K, slab_w=W, **offs)
    return jnp.asarray(slab), meta


# ------------------------------- reference (numpy) -----------------------------
def reference_forward(x, raw, *, start_tag, end_tag, H2, K):
    (w_ih_f, w_hh_f, b_ih_f, b_hh_f,
     w_ih_b, w_hh_b, b_ih_b, b_hh_b,
     w_tag, b_tag, trans, h0, c0) = [np.asarray(a, np.float32) for a in raw]
    x = np.asarray(x, np.float32)
    T = x.shape[0]

    def sigmoid(z):
        return 1.0 / (1.0 + np.exp(-z))

    def run_dir(xs, w_ih, w_hh, b_ih, b_hh, h, c):
        outs = []
        for t in range(xs.shape[0]):
            gates = xs[t] @ w_ih.T + h @ w_hh.T + b_ih + b_hh
            i = sigmoid(gates[0:H2]); f = sigmoid(gates[H2:2 * H2])
            g = np.tanh(gates[2 * H2:3 * H2]); o = sigmoid(gates[3 * H2:4 * H2])
            c = f * c + i * g
            h = o * np.tanh(c)
            outs.append(h)
        return np.stack(outs)

    hf = run_dir(x, w_ih_f, w_hh_f, b_ih_f, b_hh_f, h0[0].copy(), c0[0].copy())
    hb = run_dir(x[::-1], w_ih_b, w_hh_b, b_ih_b, b_hh_b,
                 h0[1].copy(), c0[1].copy())[::-1]
    feats = np.concatenate([hf, hb], axis=1) @ w_tag.T + b_tag

    fv = np.full((K,), -10000.0, np.float32)
    fv[start_tag] = 0.0
    bp = []
    for t in range(T):
        m = fv[None, :] + trans
        best = np.argmax(m, axis=1)
        bp.append(best)
        fv = m[np.arange(K), best] + feats[t]
    term = fv + trans[end_tag]
    best_last = int(np.argmax(term))
    score = term[best_last]
    path = [best_last]
    for t in range(T - 1, 0, -1):
        path.append(int(bp[t][path[-1]]))
    start = int(bp[0][path[-1]])
    path.reverse()
    return score, np.array(path, np.int32), feats, start


if __name__ == "__main__":
    # seq len T=8, embedding dim D=16, hidden_dim H=32 (H2=16/direction),
    # tags {B,M,E,S} + END + START => K=6.
    T, D, H = 8, 16, 32
    H2 = H // 2
    tag_to_ix = {"B": 0, "M": 1, "E": 2, "S": 3}
    END_TAG = len(tag_to_ix)            # 4
    START_TAG = len(tag_to_ix) + 1      # 5
    K = len(tag_to_ix) + 2              # 6

    key = jax.random.PRNGKey(0)
    ks = jax.random.split(key, 16)
    scale = 1.0 / np.sqrt(H2)

    def u(k, shape):
        return jax.random.uniform(k, shape, jnp.float32, -scale, scale)

    # PyTorch-shaped parameters.
    w_ih_f = u(ks[0], (4 * H2, D));  w_hh_f = u(ks[1], (4 * H2, H2))
    b_ih_f = u(ks[2], (4 * H2,));    b_hh_f = u(ks[3], (4 * H2,))
    w_ih_b = u(ks[4], (4 * H2, D));  w_hh_b = u(ks[5], (4 * H2, H2))
    b_ih_b = u(ks[6], (4 * H2,));    b_hh_b = u(ks[7], (4 * H2,))
    w_tag = u(ks[8], (K, H));        b_tag = u(ks[9], (K,))
    transitions = jax.random.normal(ks[10], (K, K), jnp.float32)
    transitions = transitions.at[START_TAG, :].set(-10000.0)
    transitions = transitions.at[:, END_TAG].set(-10000.0)
    h0 = jax.random.normal(ks[11], (2, H2), jnp.float32)   # initHidden(), fixed
    c0 = jax.random.normal(ks[12], (2, H2), jnp.float32)
    x = jax.random.normal(ks[13], (T, D), jnp.float32)      # the "sequence"

    raw = (w_ih_f, w_hh_f, b_ih_f, b_hh_f,
           w_ih_b, w_hh_b, b_ih_b, b_hh_b,
           w_tag, b_tag, transitions, h0, c0)
    slab, meta = prepare_kernel_params(raw, D=D, H2=H2, K=K)

    score, path, feats, start = bilstm_crf_forward(
        x, slab, meta, start_tag=START_TAG, end_tag=END_TAG)
    jax.block_until_ready((score, path, feats, start))

    ref_score, ref_path, ref_feats, ref_start = reference_forward(
        x, raw, start_tag=START_TAG, end_tag=END_TAG, H2=H2, K=K)

    assert np.allclose(np.asarray(feats), ref_feats, atol=1e-3), "lstm feature mismatch"
    assert np.array_equal(np.asarray(path), ref_path), "viterbi path mismatch"
    assert np.allclose(float(score), float(ref_score), rtol=1e-3, atol=1e-2), "score mismatch"
    # mirrors PyTorch's `assert start == self.START_TAG`
    assert int(start) == START_TAG and ref_start == START_TAG

    print("KERNEL_OK")
</pallas_src>

<mosaic_0001>
module attributes {stable_mosaic.version = 11 : i64} {
  func.func @bilstm_crf_kernel(%arg0: memref<8x16xf32, #tpu.memory_space<vmem>>, %arg1: memref<120x128xf32, #tpu.memory_space<vmem>>, %arg2: memref<16x128xf32, #tpu.memory_space<vmem>>) attributes {dimension_semantics = [], scalar_prefetch = 0 : i64, scratch_operands = 0 : i64, tpu.core_type = #tpu.core_type<tc>} {
    %c0 = arith.constant 0 : index
    %c0_0 = arith.constant 0 : index
    %0 = vector.load %arg1[%c0, %c0_0] : memref<120x128xf32, #tpu.memory_space<vmem>>, vector<16x128xf32>
    %c16 = arith.constant 16 : index
    %c0_1 = arith.constant 0 : index
    %1 = vector.load %arg1[%c16, %c0_1] : memref<120x128xf32, #tpu.memory_space<vmem>>, vector<16x128xf32>
    %c32 = arith.constant 32 : index
    %c0_2 = arith.constant 0 : index
    %2 = vector.load %arg1[%c32, %c0_2] : memref<120x128xf32, #tpu.memory_space<vmem>>, vector<32x128xf32>
    %c64 = arith.constant 64 : index
    %c0_3 = arith.constant 0 : index
    %3 = vector.load %arg1[%c64, %c0_3] : memref<120x128xf32, #tpu.memory_space<vmem>>, vector<32x128xf32>
    %c96 = arith.constant 96 : index
    %c0_4 = arith.constant 0 : index
    %4 = vector.load %arg1[%c96, %c0_4] : memref<120x128xf32, #tpu.memory_space<vmem>>, vector<6x6xf32>
    %c104 = arith.constant 104 : index
    %c0_5 = arith.constant 0 : index
    %5 = vector.load %arg1[%c104, %c0_5] : memref<120x128xf32, #tpu.memory_space<vmem>>, vector<6x6xf32>
    %c112 = arith.constant 112 : index
    %c0_6 = arith.constant 0 : index
    %6 = vector.load %arg1[%c112, %c0_6] : memref<120x128xf32, #tpu.memory_space<vmem>>, vector<1x128xf32>
    %c113 = arith.constant 113 : index
    %c0_7 = arith.constant 0 : index
    %7 = vector.load %arg1[%c113, %c0_7] : memref<120x128xf32, #tpu.memory_space<vmem>>, vector<1x32xf32>
    %c114 = arith.constant 114 : index
    %c0_8 = arith.constant 0 : index
    %8 = vector.load %arg1[%c114, %c0_8] : memref<120x128xf32, #tpu.memory_space<vmem>>, vector<1x32xf32>
    %c115 = arith.constant 115 : index
    %c0_9 = arith.constant 0 : index
    %9 = vector.load %arg1[%c115, %c0_9] : memref<120x128xf32, #tpu.memory_space<vmem>>, vector<1x128xf32>
    %c0_10 = arith.constant 0 : index
    %c0_11 = arith.constant 0 : index
    %10 = vector.load %arg0[%c0_10, %c0_11] : memref<8x16xf32, #tpu.memory_space<vmem>>, vector<8x16xf32>
    %cst = arith.constant dense<0.000000e+00> : vector<8x128xf32>
    %11 = tpu.matmul %10, %0, %cst {dimension_numbers = #tpu.dot_dimension_numbers<[1], [0], [0], [1], [0, 0, 1, 1], [], []>} : vector<8x16xf32>, vector<16x128xf32>, vector<8x128xf32> -> vector<8x128xf32>
    %12 = vector.broadcast %6 : vector<1x128xf32> to vector<8x128xf32>
    %13 = arith.addf %11, %12 : vector<8x128xf32>
    %cst_12 = arith.constant dense<0.000000e+00> : vector<8x128xf32>
    %14 = tpu.matmul %10, %1, %cst_12 {dimension_numbers = #tpu.dot_dimension_numbers<[1], [0], [0], [1], [0, 0, 1, 1], [], []>} : vector<8x16xf32>, vector<16x128xf32>, vector<8x128xf32> -> vector<8x128xf32>
    %15 = vector.extract_strided_slice %13 {offsets = [0, 0], sizes = [1, 128], strides = [1, 1]} : vector<8x128xf32> to vector<1x128xf32>
    %16 = vector.extract_strided_slice %14 {offsets = [7, 0], sizes = [1, 128], strides = [1, 1]} : vector<8x128xf32> to vector<1x128xf32>
    %17 = arith.addf %15, %16 : vector<1x128xf32>
    %cst_13 = arith.constant dense<0.000000e+00> : vector<1x128xf32>
    %18 = tpu.matmul %7, %2, %cst_13 {dimension_numbers = #tpu.dot_dimension_numbers<[1], [0], [0], [1], [0, 0, 1, 1], [], []>} : vector<1x32xf32>, vector<32x128xf32>, vector<1x128xf32> -> vector<1x128xf32>
    %19 = arith.addf %17, %18 : vector<1x128xf32>
    %20 = arith.negf %19 : vector<1x128xf32>
    %21 = math.exp %20 : vector<1x128xf32>
    %cst_14 = arith.constant 1.000000e+00 : f32
    %22 = vector.broadcast %cst_14 : f32 to vector<1x128xf32>
    %23 = arith.addf %22, %21 : vector<1x128xf32>
    %24 = arith.divf %22, %23 : vector<1x128xf32>
    %25 = vector.extract_strided_slice %24 {offsets = [0, 0], sizes = [1, 32], strides = [1, 1]} : vector<1x128xf32> to vector<1x32xf32>
    %26 = vector.extract_strided_slice %24 {offsets = [0, 32], sizes = [1, 32], strides = [1, 1]} : vector<1x128xf32> to vector<1x32xf32>
    %27 = vector.extract_strided_slice %24 {offsets = [0, 64], sizes = [1, 32], strides = [1, 1]} : vector<1x128xf32> to vector<1x32xf32>
    %cst_15 = arith.constant 2.000000e+00 : f32
    %28 = vector.broadcast %cst_15 : f32 to vector<1x32xf32>
    %29 = arith.mulf %28, %27 : vector<1x32xf32>
    %cst_16 = arith.constant 1.000000e+00 : f32
    %30 = vector.broadcast %cst_16 : f32 to vector<1x32xf32>
    %31 = arith.subf %29, %30 : vector<1x32xf32>
    %32 = vector.extract_strided_slice %24 {offsets = [0, 96], sizes = [1, 32], strides = [1, 1]} : vector<1x128xf32> to vector<1x32xf32>
    %33 = arith.mulf %26, %8 : vector<1x32xf32>
    %34 = arith.mulf %25, %31 : vector<1x32xf32>
    %35 = arith.addf %33, %34 : vector<1x32xf32>
    %36 = math.tanh %35 : vector<1x32xf32>
    %37 = arith.mulf %32, %36 : vector<1x32xf32>
    %38 = vector.extract_strided_slice %13 {offsets = [1, 0], sizes = [1, 128], strides = [1, 1]} : vector<8x128xf32> to vector<1x128xf32>
    %39 = vector.extract_strided_slice %14 {offsets = [6, 0], sizes = [1, 128], strides = [1, 1]} : vector<8x128xf32> to vector<1x128xf32>
    %40 = arith.addf %38, %39 : vector<1x128xf32>
    %cst_17 = arith.constant dense<0.000000e+00> : vector<1x128xf32>
    %41 = tpu.matmul %37, %2, %cst_17 {dimension_numbers = #tpu.dot_dimension_numbers<[1], [0], [0], [1], [0, 0, 1, 1], [], []>} : vector<1x32xf32>, vector<32x128xf32>, vector<1x128xf32> -> vector<1x128xf32>
    %42 = arith.addf %40, %41 : vector<1x128xf32>
    %43 = arith.negf %42 : vector<1x128xf32>
    %44 = math.exp %43 : vector<1x128xf32>
    %cst_18 = arith.constant 1.000000e+00 : f32
    %45 = vector.broadcast %cst_18 : f32 to vector<1x128xf32>
    %46 = arith.addf %45, %44 : vector<1x128xf32>
    %47 = arith.divf %45, %46 : vector<1x128xf32>
    %48 = vector.extract_strided_slice %47 {offsets = [0, 0], sizes = [1, 32], strides = [1, 1]} : vector<1x128xf32> to vector<1x32xf32>
    %49 = vector.extract_strided_slice %47 {offsets = [0, 32], sizes = [1, 32], strides = [1, 1]} : vector<1x128xf32> to vector<1x32xf32>
    %50 = vector.extract_strided_slice %47 {offsets = [0, 64], sizes = [1, 32], strides = [1, 1]} : vector<1x128xf32> to vector<1x32xf32>
    %cst_19 = arith.constant 2.000000e+00 : f32
    %51 = vector.broadcast %cst_19 : f32 to vector<1x32xf32>
    %52 = arith.mulf %51, %50 : vector<1x32xf32>
    %cst_20 = arith.constant 1.000000e+00 : f32
    %53 = vector.broadcast %cst_20 : f32 to vector<1x32xf32>
    %54 = arith.subf %52, %53 : vector<1x32xf32>
    %55 = vector.extract_strided_slice %47 {offsets = [0, 96], sizes = [1, 32], strides = [1, 1]} : vector<1x128xf32> to vector<1x32xf32>
    %56 = arith.mulf %49, %35 : vector<1x32xf32>
    %57 = arith.mulf %48, %54 : vector<1x32xf32>
    %58 = arith.addf %56, %57 : vector<1x32xf32>
    %59 = math.tanh %58 : vector<1x32xf32>
    %60 = arith.mulf %55, %59 : vector<1x32xf32>
    %61 = vector.extract_strided_slice %13 {offsets = [2, 0], sizes = [1, 128], strides = [1, 1]} : vector<8x128xf32> to vector<1x128xf32>
    %62 = vector.extract_strided_slice %14 {offsets = [5, 0], sizes = [1, 128], strides = [1, 1]} : vector<8x128xf32> to vector<1x128xf32>
    %63 = arith.addf %61, %62 : vector<1x128xf32>
    %cst_21 = arith.constant dense<0.000000e+00> : vector<1x128xf32>
    %64 = tpu.matmul %60, %2, %cst_21 {dimension_numbers = #tpu.dot_dimension_numbers<[1], [0], [0], [1], [0, 0, 1, 1], [], []>} : vector<1x32xf32>, vector<32x128xf32>, vector<1x128xf32> -> vector<1x128xf32>
    %65 = arith.addf %63, %64 : vector<1x128xf32>
    %66 = arith.negf %65 : vector<1x128xf32>
    %67 = math.exp %66 : vector<1x128xf32>
    %cst_22 = arith.constant 1.000000e+00 : f32
    %68 = vector.broadcast %cst_22 : f32 to vector<1x128xf32>
    %69 = arith.addf %68, %67 : vector<1x128xf32>
    %70 = arith.divf %68, %69 : vector<1x128xf32>
    %71 = vector.extract_strided_slice %70 {offsets = [0, 0], sizes = [1, 32], strides = [1, 1]} : vector<1x128xf32> to vector<1x32xf32>
    %72 = vector.extract_strided_slice %70 {offsets = [0, 32], sizes = [1, 32], strides = [1, 1]} : vector<1x128xf32> to vector<1x32xf32>
    %73 = vector.extract_strided_slice %70 {offsets = [0, 64], sizes = [1, 32], strides = [1, 1]} : vector<1x128xf32> to vector<1x32xf32>
    %cst_23 = arith.constant 2.000000e+00 : f32
    %74 = vector.broadcast %cst_23 : f32 to vector<1x32xf32>
    %75 = arith.mulf %74, %73 : vector<1x32xf32>
    %cst_24 = arith.constant 1.000000e+00 : f32
    %76 = vector.broadcast %cst_24 : f32 to vector<1x32xf32>
    %77 = arith.subf %75, %76 : vector<1x32xf32>
    %78 = vector.extract_strided_slice %70 {offsets = [0, 96], sizes = [1, 32], strides = [1, 1]} : vector<1x128xf32> to vector<1x32xf32>
    %79 = arith.mulf %72, %58 : vector<1x32xf32>
    %80 = arith.mulf %71, %77 : vector<1x32xf32>
    %81 = arith.addf %79, %80 : vector<1x32xf32>
    %82 = math.tanh %81 : vector<1x32xf32>
    %83 = arith.mulf %78, %82 : vector<1x32xf32>
    %84 = vector.extract_strided_slice %13 {offsets = [3, 0], sizes = [1, 128], strides = [1, 1]} : vector<8x128xf32> to vector<1x128xf32>
    %85 = vector.extract_strided_slice %14 {offsets = [4, 0], sizes = [1, 128], strides = [1, 1]} : vector<8x128xf32> to vector<1x128xf32>
    %86 = arith.addf %84, %85 : vector<1x128xf32>
    %cst_25 = arith.constant dense<0.000000e+00> : vector<1x128xf32>
    %87 = tpu.matmul %83, %2, %cst_25 {dimension_numbers = #tpu.dot_dimension_numbers<[1], [0], [0], [1], [0, 0, 1, 1], [], []>} : vector<1x32xf32>, vector<32x128xf32>, vector<1x128xf32> -> vector<1x128xf32>
    %88 = arith.addf %86, %87 : vector<1x128xf32>
    %89 = arith.negf %88 : vector<1x128xf32>
    %90 = math.exp %89 : vector<1x128xf32>
    %cst_26 = arith.constant 1.000000e+00 : f32
    %91 = vector.broadcast %cst_26 : f32 to vector<1x128xf32>
    %92 = arith.addf %91, %90 : vector<1x128xf32>
    %93 = arith.divf %91, %92 : vector<1x128xf32>
    %94 = vector.extract_strided_slice %93 {offsets = [0, 0], sizes = [1, 32], strides = [1, 1]} : vector<1x128xf32> to vector<1x32xf32>
    %95 = vector.extract_strided_slice %93 {offsets = [0, 32], sizes = [1, 32], strides = [1, 1]} : vector<1x128xf32> to vector<1x32xf32>
    %96 = vector.extract_strided_slice %93 {offsets = [0, 64], sizes = [1, 32], strides = [1, 1]} : vector<1x128xf32> to vector<1x32xf32>
    %cst_27 = arith.constant 2.000000e+00 : f32
    %97 = vector.broadcast %cst_27 : f32 to vector<1x32xf32>
    %98 = arith.mulf %97, %96 : vector<1x32xf32>
    %cst_28 = arith.constant 1.000000e+00 : f32
    %99 = vector.broadcast %cst_28 : f32 to vector<1x32xf32>
    %100 = arith.subf %98, %99 : vector<1x32xf32>
    %101 = vector.extract_strided_slice %93 {offsets = [0, 96], sizes = [1, 32], strides = [1, 1]} : vector<1x128xf32> to vector<1x32xf32>
    %102 = arith.mulf %95, %81 : vector<1x32xf32>
    %103 = arith.mulf %94, %100 : vector<1x32xf32>
    %104 = arith.addf %102, %103 : vector<1x32xf32>
    %105 = math.tanh %104 : vector<1x32xf32>
    %106 = arith.mulf %101, %105 : vector<1x32xf32>
    %107 = vector.extract_strided_slice %13 {offsets = [4, 0], sizes = [1, 128], strides = [1, 1]} : vector<8x128xf32> to vector<1x128xf32>
    %108 = vector.extract_strided_slice %14 {offsets = [3, 0], sizes = [1, 128], strides = [1, 1]} : vector<8x128xf32> to vector<1x128xf32>
    %109 = arith.addf %107, %108 : vector<1x128xf32>
    %cst_29 = arith.constant dense<0.000000e+00> : vector<1x128xf32>
    %110 = tpu.matmul %106, %2, %cst_29 {dimension_numbers = #tpu.dot_dimension_numbers<[1], [0], [0], [1], [0, 0, 1, 1], [], []>} : vector<1x32xf32>, vector<32x128xf32>, vector<1x128xf32> -> vector<1x128xf32>
    %111 = arith.addf %109, %110 : vector<1x128xf32>
    %112 = arith.negf %111 : vector<1x128xf32>
    %113 = math.exp %112 : vector<1x128xf32>
    %cst_30 = arith.constant 1.000000e+00 : f32
    %114 = vector.broadcast %cst_30 : f32 to vector<1x128xf32>
    %115 = arith.addf %114, %113 : vector<1x128xf32>
    %116 = arith.divf %114, %115 : vector<1x128xf32>
    %117 = vector.extract_strided_slice %116 {offsets = [0, 0], sizes = [1, 32], strides = [1, 1]} : vector<1x128xf32> to vector<1x32xf32>
    %118 = vector.extract_strided_slice %116 {offsets = [0, 32], sizes = [1, 32], strides = [1, 1]} : vector<1x128xf32> to vector<1x32xf32>
    %119 = vector.extract_strided_slice %116 {offsets = [0, 64], sizes = [1, 32], strides = [1, 1]} : vector<1x128xf32> to vector<1x32xf32>
    %cst_31 = arith.constant 2.000000e+00 : f32
    %120 = vector.broadcast %cst_31 : f32 to vector<1x32xf32>
    %121 = arith.mulf %120, %119 : vector<1x32xf32>
    %cst_32 = arith.constant 1.000000e+00 : f32
    %122 = vector.broadcast %cst_32 : f32 to vector<1x32xf32>
    %123 = arith.subf %121, %122 : vector<1x32xf32>
    %124 = vector.extract_strided_slice %116 {offsets = [0, 96], sizes = [1, 32], strides = [1, 1]} : vector<1x128xf32> to vector<1x32xf32>
    %125 = arith.mulf %118, %104 : vector<1x32xf32>
    %126 = arith.mulf %117, %123 : vector<1x32xf32>
    %127 = arith.addf %125, %126 : vector<1x32xf32>
    %128 = math.tanh %127 : vector<1x32xf32>
    %129 = arith.mulf %124, %128 : vector<1x32xf32>
    %130 = vector.extract_strided_slice %13 {offsets = [5, 0], sizes = [1, 128], strides = [1, 1]} : vector<8x128xf32> to vector<1x128xf32>
    %131 = vector.extract_strided_slice %14 {offsets = [2, 0], sizes = [1, 128], strides = [1, 1]} : vector<8x128xf32> to vector<1x128xf32>
    %132 = arith.addf %130, %131 : vector<1x128xf32>
    %cst_33 = arith.constant dense<0.000000e+00> : vector<1x128xf32>
    %133 = tpu.matmul %129, %2, %cst_33 {dimension_numbers = #tpu.dot_dimension_numbers<[1], [0], [0], [1], [0, 0, 1, 1], [], []>} : vector<1x32xf32>, vector<32x128xf32>, vector<1x128xf32> -> vector<1x128xf32>
    %134 = arith.addf %132, %133 : vector<1x128xf32>
    %135 = arith.negf %134 : vector<1x128xf32>
    %136 = math.exp %135 : vector<1x128xf32>
    %cst_34 = arith.constant 1.000000e+00 : f32
    %137 = vector.broadcast %cst_34 : f32 to vector<1x128xf32>
    %138 = arith.addf %137, %136 : vector<1x128xf32>
    %139 = arith.divf %137, %138 : vector<1x128xf32>
    %140 = vector.extract_strided_slice %139 {offsets = [0, 0], sizes = [1, 32], strides = [1, 1]} : vector<1x128xf32> to vector<1x32xf32>
    %141 = vector.extract_strided_slice %139 {offsets = [0, 32], sizes = [1, 32], strides = [1, 1]} : vector<1x128xf32> to vector<1x32xf32>
    %142 = vector.extract_strided_slice %139 {offsets = [0, 64], sizes = [1, 32], strides = [1, 1]} : vector<1x128xf32> to vector<1x32xf32>
    %cst_35 = arith.constant 2.000000e+00 : f32
    %143 = vector.broadcast %cst_35 : f32 to vector<1x32xf32>
    %144 = arith.mulf %143, %142 : vector<1x32xf32>
    %cst_36 = arith.constant 1.000000e+00 : f32
    %145 = vector.broadcast %cst_36 : f32 to vector<1x32xf32>
    %146 = arith.subf %144, %145 : vector<1x32xf32>
    %147 = vector.extract_strided_slice %139 {offsets = [0, 96], sizes = [1, 32], strides = [1, 1]} : vector<1x128xf32> to vector<1x32xf32>
    %148 = arith.mulf %141, %127 : vector<1x32xf32>
    %149 = arith.mulf %140, %146 : vector<1x32xf32>
    %150 = arith.addf %148, %149 : vector<1x32xf32>
    %151 = math.tanh %150 : vector<1x32xf32>
    %152 = arith.mulf %147, %151 : vector<1x32xf32>
    %153 = vector.extract_strided_slice %13 {offsets = [6, 0], sizes = [1, 128], strides = [1, 1]} : vector<8x128xf32> to vector<1x128xf32>
    %154 = vector.extract_strided_slice %14 {offsets = [1, 0], sizes = [1, 128], strides = [1, 1]} : vector<8x128xf32> to vector<1x128xf32>
    %155 = arith.addf %153, %154 : vector<1x128xf32>
    %cst_37 = arith.constant dense<0.000000e+00> : vector<1x128xf32>
    %156 = tpu.matmul %152, %2, %cst_37 {dimension_numbers = #tpu.dot_dimension_numbers<[1], [0], [0], [1], [0, 0, 1, 1], [], []>} : vector<1x32xf32>, vector<32x128xf32>, vector<1x128xf32> -> vector<1x128xf32>
    %157 = arith.addf %155, %156 : vector<1x128xf32>
    %158 = arith.negf %157 : vector<1x128xf32>
    %159 = math.exp %158 : vector<1x128xf32>
    %cst_38 = arith.constant 1.000000e+00 : f32
    %160 = vector.broadcast %cst_38 : f32 to vector<1x128xf32>
    %161 = arith.addf %160, %159 : vector<1x128xf32>
    %162 = arith.divf %160, %161 : vector<1x128xf32>
    %163 = vector.extract_strided_slice %162 {offsets = [0, 0], sizes = [1, 32], strides = [1, 1]} : vector<1x128xf32> to vector<1x32xf32>
    %164 = vector.extract_strided_slice %162 {offsets = [0, 32], sizes = [1, 32], strides = [1, 1]} : vector<1x128xf32> to vector<1x32xf32>
    %165 = vector.extract_strided_slice %162 {offsets = [0, 64], sizes = [1, 32], strides = [1, 1]} : vector<1x128xf32> to vector<1x32xf32>
    %cst_39 = arith.constant 2.000000e+00 : f32
    %166 = vector.broadcast %cst_39 : f32 to vector<1x32xf32>
    %167 = arith.mulf %166, %165 : vector<1x32xf32>
    %cst_40 = arith.constant 1.000000e+00 : f32
    %168 = vector.broadcast %cst_40 : f32 to vector<1x32xf32>
    %169 = arith.subf %167, %168 : vector<1x32xf32>
    %170 = vector.extract_strided_slice %162 {offsets = [0, 96], sizes = [1, 32], strides = [1, 1]} : vector<1x128xf32> to vector<1x32xf32>
    %171 = arith.mulf %164, %150 : vector<1x32xf32>
    %172 = arith.mulf %163, %169 : vector<1x32xf32>
    %173 = arith.addf %171, %172 : vector<1x32xf32>
    %174 = math.tanh %173 : vector<1x32xf32>
    %175 = arith.mulf %170, %174 : vector<1x32xf32>
    %176 = vector.extract_strided_slice %13 {offsets = [7, 0], sizes = [1, 128], strides = [1, 1]} : vector<8x128xf32> to vector<1x128xf32>
    %177 = vector.extract_strided_slice %14 {offsets = [0, 0], sizes = [1, 128], strides = [1, 1]} : vector<8x128xf32> to vector<1x128xf32>
    %178 = arith.addf %176, %177 : vector<1x128xf32>
    %cst_41 = arith.constant dense<0.000000e+00> : vector<1x128xf32>
    %179 = tpu.matmul %175, %2, %cst_41 {dimension_numbers = #tpu.dot_dimension_numbers<[1], [0], [0], [1], [0, 0, 1, 1], [], []>} : vector<1x32xf32>, vector<32x128xf32>, vector<1x128xf32> -> vector<1x128xf32>
    %180 = arith.addf %178, %179 : vector<1x128xf32>
    %181 = arith.negf %180 : vector<1x128xf32>
    %182 = math.exp %181 : vector<1x128xf32>
    %cst_42 = arith.constant 1.000000e+00 : f32
    %183 = vector.broadcast %cst_42 : f32 to vector<1x128xf32>
    %184 = arith.addf %183, %182 : vector<1x128xf32>
    %185 = arith.divf %183, %184 : vector<1x128xf32>
    %186 = vector.extract_strided_slice %185 {offsets = [0, 0], sizes = [1, 32], strides = [1, 1]} : vector<1x128xf32> to vector<1x32xf32>
    %187 = vector.extract_strided_slice %185 {offsets = [0, 32], sizes = [1, 32], strides = [1, 1]} : vector<1x128xf32> to vector<1x32xf32>
    %188 = vector.extract_strided_slice %185 {offsets = [0, 64], sizes = [1, 32], strides = [1, 1]} : vector<1x128xf32> to vector<1x32xf32>
    %cst_43 = arith.constant 2.000000e+00 : f32
    %189 = vector.broadcast %cst_43 : f32 to vector<1x32xf32>
    %190 = arith.mulf %189, %188 : vector<1x32xf32>
    %cst_44 = arith.constant 1.000000e+00 : f32
    %191 = vector.broadcast %cst_44 : f32 to vector<1x32xf32>
    %192 = arith.subf %190, %191 : vector<1x32xf32>
    %193 = vector.extract_strided_slice %185 {offsets = [0, 96], sizes = [1, 32], strides = [1, 1]} : vector<1x128xf32> to vector<1x32xf32>
    %194 = arith.mulf %187, %173 : vector<1x32xf32>
    %195 = arith.mulf %186, %192 : vector<1x32xf32>
    %196 = arith.addf %194, %195 : vector<1x32xf32>
    %197 = math.tanh %196 : vector<1x32xf32>
    %198 = arith.mulf %193, %197 : vector<1x32xf32>
    %199 = tpu.iota {dimensions = array<i32: 1>} : vector<1x32xi32>
    %c16_i32 = arith.constant 16 : i32
    %200 = vector.broadcast %c16_i32 : i32 to vector<1x32xi32>
    %201 = arith.cmpi slt, %199, %200 : vector<1x32xi32>
    %202 = arith.select %201, %37, %198 : vector<1x32xi1>, vector<1x32xf32>
    %203 = arith.select %201, %60, %175 : vector<1x32xi1>, vector<1x32xf32>
    %204 = arith.select %201, %83, %152 : vector<1x32xi1>, vector<1x32xf32>
    %205 = arith.select %201, %106, %129 : vector<1x32xi1>, vector<1x32xf32>
    %206 = arith.select %201, %129, %106 : vector<1x32xi1>, vector<1x32xf32>
    %207 = arith.select %201, %152, %83 : vector<1x32xi1>, vector<1x32xf32>
    %208 = arith.select %201, %175, %60 : vector<1x32xi1>, vector<1x32xf32>
    %209 = arith.select %201, %198, %37 : vector<1x32xi1>, vector<1x32xf32>
    %210 = tpu.concatenate %202, %203, %204, %205, %206, %207, %208, %209 in 0 : vector<1x32xf32>, vector<1x32xf32>, vector<1x32xf32>, vector<1x32xf32>, vector<1x32xf32>, vector<1x32xf32>, vector<1x32xf32>, vector<1x32xf32> -> vector<8x32xf32>
    %cst_45 = arith.constant dense<0.000000e+00> : vector<8x128xf32>
    %211 = tpu.matmul %210, %3, %cst_45 {dimension_numbers = #tpu.dot_dimension_numbers<[1], [0], [0], [1], [0, 0, 1, 1], [], []>} : vector<8x32xf32>, vector<32x128xf32>, vector<8x128xf32> -> vector<8x128xf32>
    %212 = vector.broadcast %9 : vector<1x128xf32> to vector<8x128xf32>
    %213 = arith.addf %211, %212 : vector<8x128xf32>
    %214 = tpu.iota {dimensions = array<i32: 1>} : vector<6x6xi32>
    %215 = arith.sitofp %214 : vector<6x6xi32> to vector<6x6xf32>
    %216 = tpu.iota {dimensions = array<i32: 0>} : vector<6x6xi32>
    %217 = arith.sitofp %216 : vector<6x6xi32> to vector<6x6xf32>
    %218 = tpu.iota {dimensions = array<i32: 1>} : vector<1x6xi32>
    %219 = arith.sitofp %218 : vector<1x6xi32> to vector<1x6xf32>
    %220 = tpu.iota {dimensions = array<i32: 0>} : vector<6x1xi32>
    %221 = arith.sitofp %220 : vector<6x1xi32> to vector<6x1xf32>
    %cst_46 = arith.constant 5.000000e+00 : f32
    %222 = vector.broadcast %cst_46 : f32 to vector<1x6xf32>
    %223 = arith.cmpf oeq, %219, %222 : vector<1x6xf32>
    %cst_47 = arith.constant 0.000000e+00 : f32
    %cst_48 = arith.constant -1.000000e+04 : f32
    %224 = vector.broadcast %cst_47 : f32 to vector<1x6xf32>
    %225 = vector.broadcast %cst_48 : f32 to vector<1x6xf32>
    %226 = arith.select %223, %224, %225 : vector<1x6xi1>, vector<1x6xf32>
    %227 = vector.broadcast %226 : vector<1x6xf32> to vector<6x6xf32>
    %228 = arith.addf %227, %4 : vector<6x6xf32>
    %cst_49 = arith.constant dense<0xFF800000> : vector<6xf32>
    %229 = vector.multi_reduction <maximumf>, %228, %cst_49 [1] : vector<6x6xf32> to vector<6xf32>
    %230 = vector.shape_cast %229 : vector<6xf32> to vector<6x1xf32>
    %231 = vector.broadcast %230 : vector<6x1xf32> to vector<6x6xf32>
    %232 = arith.cmpf oeq, %228, %231 : vector<6x6xf32>
    %cst_50 = arith.constant 6.000000e+00 : f32
    %233 = vector.broadcast %cst_50 : f32 to vector<6x6xf32>
    %234 = arith.select %232, %215, %233 : vector<6x6xi1>, vector<6x6xf32>
    %cst_51 = arith.constant dense<0x7F800000> : vector<6xf32>
    %235 = vector.multi_reduction <minimumf>, %234, %cst_51 [1] : vector<6x6xf32> to vector<6xf32>
    %236 = vector.shape_cast %235 : vector<6xf32> to vector<6x1xf32>
    %237 = vector.extract_strided_slice %213 {offsets = [0, 0], sizes = [1, 6], strides = [1, 1]} : vector<8x128xf32> to vector<1x6xf32>
    %238 = vector.shape_cast %237 : vector<1x6xf32> to vector<6x1xf32>
    %239 = arith.addf %230, %238 : vector<6x1xf32>
    %240 = vector.broadcast %239 : vector<6x1xf32> to vector<6x6xf32>
    %241 = arith.addf %240, %5 : vector<6x6xf32>
    %cst_52 = arith.constant dense<0xFF800000> : vector<6xf32>
    %242 = vector.multi_reduction <maximumf>, %241, %cst_52 [0] : vector<6x6xf32> to vector<6xf32>
    %243 = vector.shape_cast %242 : vector<6xf32> to vector<1x6xf32>
    %244 = vector.broadcast %243 : vector<1x6xf32> to vector<6x6xf32>
    %245 = arith.cmpf oeq, %241, %244 : vector<6x6xf32>
    %cst_53 = arith.constant 6.000000e+00 : f32
    %246 = vector.broadcast %cst_53 : f32 to vector<6x6xf32>
    %247 = arith.select %245, %217, %246 : vector<6x6xi1>, vector<6x6xf32>
    %cst_54 = arith.constant dense<0x7F800000> : vector<6xf32>
    %248 = vector.multi_reduction <minimumf>, %247, %cst_54 [0] : vector<6x6xf32> to vector<6xf32>
    %249 = vector.shape_cast %248 : vector<6xf32> to vector<1x6xf32>
    %250 = vector.extract_strided_slice %213 {offsets = [1, 0], sizes = [1, 6], strides = [1, 1]} : vector<8x128xf32> to vector<1x6xf32>
    %251 = arith.addf %243, %250 : vector<1x6xf32>
    %252 = vector.broadcast %251 : vector<1x6xf32> to vector<6x6xf32>
    %253 = arith.addf %252, %4 : vector<6x6xf32>
    %cst_55 = arith.constant dense<0xFF800000> : vector<6xf32>
    %254 = vector.multi_reduction <maximumf>, %253, %cst_55 [1] : vector<6x6xf32> to vector<6xf32>
    %255 = vector.shape_cast %254 : vector<6xf32> to vector<6x1xf32>
    %256 = vector.broadcast %255 : vector<6x1xf32> to vector<6x6xf32>
    %257 = arith.cmpf oeq, %253, %256 : vector<6x6xf32>
    %cst_56 = arith.constant 6.000000e+00 : f32
    %258 = vector.broadcast %cst_56 : f32 to vector<6x6xf32>
    %259 = arith.select %257, %215, %258 : vector<6x6xi1>, vector<6x6xf32>
    %cst_57 = arith.constant dense<0x7F800000> : vector<6xf32>
    %260 = vector.multi_reduction <minimumf>, %259, %cst_57 [1] : vector<6x6xf32> to vector<6xf32>
    %261 = vector.shape_cast %260 : vector<6xf32> to vector<6x1xf32>
    %262 = vector.extract_strided_slice %213 {offsets = [2, 0], sizes = [1, 6], strides = [1, 1]} : vector<8x128xf32> to vector<1x6xf32>
    %263 = vector.shape_cast %262 : vector<1x6xf32> to vector<6x1xf32>
    %264 = arith.addf %255, %263 : vector<6x1xf32>
    %265 = vector.broadcast %264 : vector<6x1xf32> to vector<6x6xf32>
    %266 = arith.addf %265, %5 : vector<6x6xf32>
    %cst_58 = arith.constant dense<0xFF800000> : vector<6xf32>
    %267 = vector.multi_reduction <maximumf>, %266, %cst_58 [0] : vector<6x6xf32> to vector<6xf32>
    %268 = vector.shape_cast %267 : vector<6xf32> to vector<1x6xf32>
    %269 = vector.broadcast %268 : vector<1x6xf32> to vector<6x6xf32>
    %270 = arith.cmpf oeq, %266, %269 : vector<6x6xf32>
    %cst_59 = arith.constant 6.000000e+00 : f32
    %271 = vector.broadcast %cst_59 : f32 to vector<6x6xf32>
    %272 = arith.select %270, %217, %271 : vector<6x6xi1>, vector<6x6xf32>
    %cst_60 = arith.constant dense<0x7F800000> : vector<6xf32>
    %273 = vector.multi_reduction <minimumf>, %272, %cst_60 [0] : vector<6x6xf32> to vector<6xf32>
    %274 = vector.shape_cast %273 : vector<6xf32> to vector<1x6xf32>
    %275 = vector.extract_strided_slice %213 {offsets = [3, 0], sizes = [1, 6], strides = [1, 1]} : vector<8x128xf32> to vector<1x6xf32>
    %276 = arith.addf %268, %275 : vector<1x6xf32>
    %277 = vector.broadcast %276 : vector<1x6xf32> to vector<6x6xf32>
    %278 = arith.addf %277, %4 : vector<6x6xf32>
    %cst_61 = arith.constant dense<0xFF800000> : vector<6xf32>
    %279 = vector.multi_reduction <maximumf>, %278, %cst_61 [1] : vector<6x6xf32> to vector<6xf32>
    %280 = vector.shape_cast %279 : vector<6xf32> to vector<6x1xf32>
    %281 = vector.broadcast %280 : vector<6x1xf32> to vector<6x6xf32>
    %282 = arith.cmpf oeq, %278, %281 : vector<6x6xf32>
    %cst_62 = arith.constant 6.000000e+00 : f32
    %283 = vector.broadcast %cst_62 : f32 to vector<6x6xf32>
    %284 = arith.select %282, %215, %283 : vector<6x6xi1>, vector<6x6xf32>
    %cst_63 = arith.constant dense<0x7F800000> : vector<6xf32>
    %285 = vector.multi_reduction <minimumf>, %284, %cst_63 [1] : vector<6x6xf32> to vector<6xf32>
    %286 = vector.shape_cast %285 : vector<6xf32> to vector<6x1xf32>
    %287 = vector.extract_strided_slice %213 {offsets = [4, 0], sizes = [1, 6], strides = [1, 1]} : vector<8x128xf32> to vector<1x6xf32>
    %288 = vector.shape_cast %287 : vector<1x6xf32> to vector<6x1xf32>
    %289 = arith.addf %280, %288 : vector<6x1xf32>
    %290 = vector.broadcast %289 : vector<6x1xf32> to vector<6x6xf32>
    %291 = arith.addf %290, %5 : vector<6x6xf32>
    %cst_64 = arith.constant dense<0xFF800000> : vector<6xf32>
    %292 = vector.multi_reduction <maximumf>, %291, %cst_64 [0] : vector<6x6xf32> to vector<6xf32>
    %293 = vector.shape_cast %292 : vector<6xf32> to vector<1x6xf32>
    %294 = vector.broadcast %293 : vector<1x6xf32> to vector<6x6xf32>
    %295 = arith.cmpf oeq, %291, %294 : vector<6x6xf32>
    %cst_65 = arith.constant 6.000000e+00 : f32
    %296 = vector.broadcast %cst_65 : f32 to vector<6x6xf32>
    %297 = arith.select %295, %217, %296 : vector<6x6xi1>, vector<6x6xf32>
    %cst_66 = arith.constant dense<0x7F800000> : vector<6xf32>
    %298 = vector.multi_reduction <minimumf>, %297, %cst_66 [0] : vector<6x6xf32> to vector<6xf32>
    %299 = vector.shape_cast %298 : vector<6xf32> to vector<1x6xf32>
    %300 = vector.extract_strided_slice %213 {offsets = [5, 0], sizes = [1, 6], strides = [1, 1]} : vector<8x128xf32> to vector<1x6xf32>
    %301 = arith.addf %293, %300 : vector<1x6xf32>
    %302 = vector.broadcast %301 : vector<1x6xf32> to vector<6x6xf32>
    %303 = arith.addf %302, %4 : vector<6x6xf32>
    %cst_67 = arith.constant dense<0xFF800000> : vector<6xf32>
    %304 = vector.multi_reduction <maximumf>, %303, %cst_67 [1] : vector<6x6xf32> to vector<6xf32>
    %305 = vector.shape_cast %304 : vector<6xf32> to vector<6x1xf32>
    %306 = vector.broadcast %305 : vector<6x1xf32> to vector<6x6xf32>
    %307 = arith.cmpf oeq, %303, %306 : vector<6x6xf32>
    %cst_68 = arith.constant 6.000000e+00 : f32
    %308 = vector.broadcast %cst_68 : f32 to vector<6x6xf32>
    %309 = arith.select %307, %215, %308 : vector<6x6xi1>, vector<6x6xf32>
    %cst_69 = arith.constant dense<0x7F800000> : vector<6xf32>
    %310 = vector.multi_reduction <minimumf>, %309, %cst_69 [1] : vector<6x6xf32> to vector<6xf32>
    %311 = vector.shape_cast %310 : vector<6xf32> to vector<6x1xf32>
    %312 = vector.extract_strided_slice %213 {offsets = [6, 0], sizes = [1, 6], strides = [1, 1]} : vector<8x128xf32> to vector<1x6xf32>
    %313 = vector.shape_cast %312 : vector<1x6xf32> to vector<6x1xf32>
    %314 = arith.addf %305, %313 : vector<6x1xf32>
    %315 = vector.broadcast %314 : vector<6x1xf32> to vector<6x6xf32>
    %316 = arith.addf %315, %5 : vector<6x6xf32>
    %cst_70 = arith.constant dense<0xFF800000> : vector<6xf32>
    %317 = vector.multi_reduction <maximumf>, %316, %cst_70 [0] : vector<6x6xf32> to vector<6xf32>
    %318 = vector.shape_cast %317 : vector<6xf32> to vector<1x6xf32>
    %319 = vector.broadcast %318 : vector<1x6xf32> to vector<6x6xf32>
    %320 = arith.cmpf oeq, %316, %319 : vector<6x6xf32>
    %cst_71 = arith.constant 6.000000e+00 : f32
    %321 = vector.broadcast %cst_71 : f32 to vector<6x6xf32>
    %322 = arith.select %320, %217, %321 : vector<6x6xi1>, vector<6x6xf32>
    %cst_72 = arith.constant dense<0x7F800000> : vector<6xf32>
    %323 = vector.multi_reduction <minimumf>, %322, %cst_72 [0] : vector<6x6xf32> to vector<6xf32>
    %324 = vector.shape_cast %323 : vector<6xf32> to vector<1x6xf32>
    %325 = vector.extract_strided_slice %213 {offsets = [7, 0], sizes = [1, 6], strides = [1, 1]} : vector<8x128xf32> to vector<1x6xf32>
    %326 = arith.addf %318, %325 : vector<1x6xf32>
    %327 = vector.extract_strided_slice %4 {offsets = [4, 0], sizes = [1, 6], strides = [1, 1]} : vector<6x6xf32> to vector<1x6xf32>
    %328 = arith.addf %326, %327 : vector<1x6xf32>
    %cst_73 = arith.constant dense<0xFF800000> : vector<1xf32>
    %329 = vector.multi_reduction <maximumf>, %328, %cst_73 [1] : vector<1x6xf32> to vector<1xf32>
    %330 = vector.shape_cast %329 : vector<1xf32> to vector<1x1xf32>
    %331 = vector.broadcast %330 : vector<1x1xf32> to vector<1x6xf32>
    %332 = arith.cmpf oeq, %328, %331 : vector<1x6xf32>
    %cst_74 = arith.constant 6.000000e+00 : f32
    %333 = vector.broadcast %cst_74 : f32 to vector<1x6xf32>
    %334 = arith.select %332, %219, %333 : vector<1x6xi1>, vector<1x6xf32>
    %cst_75 = arith.constant dense<0x7F800000> : vector<1xf32>
    %335 = vector.multi_reduction <minimumf>, %334, %cst_75 [1] : vector<1x6xf32> to vector<1xf32>
    %336 = vector.shape_cast %335 : vector<1xf32> to vector<1x1xf32>
    %337 = vector.broadcast %336 : vector<1x1xf32> to vector<1x6xf32>
    %338 = arith.cmpf oeq, %219, %337 : vector<1x6xf32>
    %cst_76 = arith.constant 0.000000e+00 : f32
    %339 = vector.broadcast %cst_76 : f32 to vector<1x6xf32>
    %340 = arith.select %338, %324, %339 : vector<1x6xi1>, vector<1x6xf32>
    %cst_77 = arith.constant dense<0.000000e+00> : vector<1xf32>
    %341 = vector.multi_reduction <add>, %340, %cst_77 [1] : vector<1x6xf32> to vector<1xf32>
    %342 = vector.shape_cast %341 : vector<1xf32> to vector<1x1xf32>
    %343 = vector.broadcast %342 : vector<1x1xf32> to vector<6x1xf32>
    %344 = arith.cmpf oeq, %221, %343 : vector<6x1xf32>
    %cst_78 = arith.constant 0.000000e+00 : f32
    %345 = vector.broadcast %cst_78 : f32 to vector<6x1xf32>
    %346 = arith.select %344, %311, %345 : vector<6x1xi1>, vector<6x1xf32>
    %cst_79 = arith.constant dense<0.000000e+00> : vector<1xf32>
    %347 = vector.multi_reduction <add>, %346, %cst_79 [0] : vector<6x1xf32> to vector<1xf32>
    %348 = vector.shape_cast %347 : vector<1xf32> to vector<1x1xf32>
    %349 = vector.broadcast %348 : vector<1x1xf32> to vector<1x6xf32>
    %350 = arith.cmpf oeq, %219, %349 : vector<1x6xf32>
    %cst_80 = arith.constant 0.000000e+00 : f32
    %351 = vector.broadcast %cst_80 : f32 to vector<1x6xf32>
    %352 = arith.select %350, %299, %351 : vector<1x6xi1>, vector<1x6xf32>
    %cst_81 = arith.constant dense<0.000000e+00> : vector<1xf32>
    %353 = vector.multi_reduction <add>, %352, %cst_81 [1] : vector<1x6xf32> to vector<1xf32>
    %354 = vector.shape_cast %353 : vector<1xf32> to vector<1x1xf32>
    %355 = vector.broadcast %354 : vector<1x1xf32> to vector<6x1xf32>
    %356 = arith.cmpf oeq, %221, %355 : vector<6x1xf32>
    %cst_82 = arith.constant 0.000000e+00 : f32
    %357 = vector.broadcast %cst_82 : f32 to vector<6x1xf32>
    %358 = arith.select %356, %286, %357 : vector<6x1xi1>, vector<6x1xf32>
    %cst_83 = arith.constant dense<0.000000e+00> : vector<1xf32>
    %359 = vector.multi_reduction <add>, %358, %cst_83 [0] : vector<6x1xf32> to vector<1xf32>
    %360 = vector.shape_cast %359 : vector<1xf32> to vector<1x1xf32>
    %361 = vector.broadcast %360 : vector<1x1xf32> to vector<1x6xf32>
    %362 = arith.cmpf oeq, %219, %361 : vector<1x6xf32>
    %cst_84 = arith.constant 0.000000e+00 : f32
    %363 = vector.broadcast %cst_84 : f32 to vector<1x6xf32>
    %364 = arith.select %362, %274, %363 : vector<1x6xi1>, vector<1x6xf32>
    %cst_85 = arith.constant dense<0.000000e+00> : vector<1xf32>
    %365 = vector.multi_reduction <add>, %364, %cst_85 [1] : vector<1x6xf32> to vector<1xf32>
    %366 = vector.shape_cast %365 : vector<1xf32> to vector<1x1xf32>
    %367 = vector.broadcast %366 : vector<1x1xf32> to vector<6x1xf32>
    %368 = arith.cmpf oeq, %221, %367 : vector<6x1xf32>
    %cst_86 = arith.constant 0.000000e+00 : f32
    %369 = vector.broadcast %cst_86 : f32 to vector<6x1xf32>
    %370 = arith.select %368, %261, %369 : vector<6x1xi1>, vector<6x1xf32>
    %cst_87 = arith.constant dense<0.000000e+00> : vector<1xf32>
    %371 = vector.multi_reduction <add>, %370, %cst_87 [0] : vector<6x1xf32> to vector<1xf32>
    %372 = vector.shape_cast %371 : vector<1xf32> to vector<1x1xf32>
    %373 = vector.broadcast %372 : vector<1x1xf32> to vector<1x6xf32>
    %374 = arith.cmpf oeq, %219, %373 : vector<1x6xf32>
    %cst_88 = arith.constant 0.000000e+00 : f32
    %375 = vector.broadcast %cst_88 : f32 to vector<1x6xf32>
    %376 = arith.select %374, %249, %375 : vector<1x6xi1>, vector<1x6xf32>
    %cst_89 = arith.constant dense<0.000000e+00> : vector<1xf32>
    %377 = vector.multi_reduction <add>, %376, %cst_89 [1] : vector<1x6xf32> to vector<1xf32>
    %378 = vector.shape_cast %377 : vector<1xf32> to vector<1x1xf32>
    %379 = vector.broadcast %378 : vector<1x1xf32> to vector<6x1xf32>
    %380 = arith.cmpf oeq, %221, %379 : vector<6x1xf32>
    %cst_90 = arith.constant 0.000000e+00 : f32
    %381 = vector.broadcast %cst_90 : f32 to vector<6x1xf32>
    %382 = arith.select %380, %236, %381 : vector<6x1xi1>, vector<6x1xf32>
    %cst_91 = arith.constant dense<0.000000e+00> : vector<1xf32>
    %383 = vector.multi_reduction <add>, %382, %cst_91 [0] : vector<6x1xf32> to vector<1xf32>
    %384 = vector.shape_cast %383 : vector<1xf32> to vector<1x1xf32>
    %385 = tpu.iota {dimensions = array<i32: 1>} : vector<1x128xi32>
    %cst_92 = arith.constant 0.000000e+00 : f32
    %386 = vector.broadcast %cst_92 : f32 to vector<1x128xf32>
    %c0_i32 = arith.constant 0 : i32
    %387 = vector.broadcast %c0_i32 : i32 to vector<1x128xi32>
    %388 = arith.cmpi eq, %385, %387 : vector<1x128xi32>
    %389 = vector.shape_cast %378 : vector<1x1xf32> to vector<1x1xf32>
    %390 = vector.broadcast %389 : vector<1x1xf32> to vector<1x128xf32>
    %391 = arith.select %388, %390, %386 : vector<1x128xi1>, vector<1x128xf32>
    %c1_i32 = arith.constant 1 : i32
    %392 = vector.broadcast %c1_i32 : i32 to vector<1x128xi32>
    %393 = arith.cmpi eq, %385, %392 : vector<1x128xi32>
    %394 = vector.shape_cast %372 : vector<1x1xf32> to vector<1x1xf32>
    %395 = vector.broadcast %394 : vector<1x1xf32> to vector<1x128xf32>
    %396 = arith.select %393, %395, %391 : vector<1x128xi1>, vector<1x128xf32>
    %c2_i32 = arith.constant 2 : i32
    %397 = vector.broadcast %c2_i32 : i32 to vector<1x128xi32>
    %398 = arith.cmpi eq, %385, %397 : vector<1x128xi32>
    %399 = vector.shape_cast %366 : vector<1x1xf32> to vector<1x1xf32>
    %400 = vector.broadcast %399 : vector<1x1xf32> to vector<1x128xf32>
    %401 = arith.select %398, %400, %396 : vector<1x128xi1>, vector<1x128xf32>
    %c3_i32 = arith.constant 3 : i32
    %402 = vector.broadcast %c3_i32 : i32 to vector<1x128xi32>
    %403 = arith.cmpi eq, %385, %402 : vector<1x128xi32>
    %404 = vector.shape_cast %360 : vector<1x1xf32> to vector<1x1xf32>
    %405 = vector.broadcast %404 : vector<1x1xf32> to vector<1x128xf32>
    %406 = arith.select %403, %405, %401 : vector<1x128xi1>, vector<1x128xf32>
    %c4_i32 = arith.constant 4 : i32
    %407 = vector.broadcast %c4_i32 : i32 to vector<1x128xi32>
    %408 = arith.cmpi eq, %385, %407 : vector<1x128xi32>
    %409 = vector.shape_cast %354 : vector<1x1xf32> to vector<1x1xf32>
    %410 = vector.broadcast %409 : vector<1x1xf32> to vector<1x128xf32>
    %411 = arith.select %408, %410, %406 : vector<1x128xi1>, vector<1x128xf32>
    %c5_i32 = arith.constant 5 : i32
    %412 = vector.broadcast %c5_i32 : i32 to vector<1x128xi32>
    %413 = arith.cmpi eq, %385, %412 : vector<1x128xi32>
    %414 = vector.shape_cast %348 : vector<1x1xf32> to vector<1x1xf32>
    %415 = vector.broadcast %414 : vector<1x1xf32> to vector<1x128xf32>
    %416 = arith.select %413, %415, %411 : vector<1x128xi1>, vector<1x128xf32>
    %c6_i32 = arith.constant 6 : i32
    %417 = vector.broadcast %c6_i32 : i32 to vector<1x128xi32>
    %418 = arith.cmpi eq, %385, %417 : vector<1x128xi32>
    %419 = vector.shape_cast %342 : vector<1x1xf32> to vector<1x1xf32>
    %420 = vector.broadcast %419 : vector<1x1xf32> to vector<1x128xf32>
    %421 = arith.select %418, %420, %416 : vector<1x128xi1>, vector<1x128xf32>
    %c7_i32 = arith.constant 7 : i32
    %422 = vector.broadcast %c7_i32 : i32 to vector<1x128xi32>
    %423 = arith.cmpi eq, %385, %422 : vector<1x128xi32>
    %424 = vector.shape_cast %336 : vector<1x1xf32> to vector<1x1xf32>
    %425 = vector.broadcast %424 : vector<1x1xf32> to vector<1x128xf32>
    %426 = arith.select %423, %425, %421 : vector<1x128xi1>, vector<1x128xf32>
    %c8_i32 = arith.constant 8 : i32
    %427 = vector.broadcast %c8_i32 : i32 to vector<1x128xi32>
    %428 = arith.cmpi eq, %385, %427 : vector<1x128xi32>
    %429 = vector.shape_cast %330 : vector<1x1xf32> to vector<1x1xf32>
    %430 = vector.broadcast %429 : vector<1x1xf32> to vector<1x128xf32>
    %431 = arith.select %428, %430, %426 : vector<1x128xi1>, vector<1x128xf32>
    %c9_i32 = arith.constant 9 : i32
    %432 = vector.broadcast %c9_i32 : i32 to vector<1x128xi32>
    %433 = arith.cmpi eq, %385, %432 : vector<1x128xi32>
    %434 = vector.shape_cast %384 : vector<1x1xf32> to vector<1x1xf32>
    %435 = vector.broadcast %434 : vector<1x1xf32> to vector<1x128xf32>
    %436 = arith.select %433, %435, %431 : vector<1x128xi1>, vector<1x128xf32>
    %cst_93 = arith.constant 0.000000e+00 : f32
    %437 = vector.broadcast %cst_93 : f32 to vector<7x128xf32>
    %438 = tpu.concatenate %213, %436, %437 in 0 : vector<8x128xf32>, vector<1x128xf32>, vector<7x128xf32> -> vector<16x128xf32>
    %c0_94 = arith.constant 0 : index
    %c0_95 = arith.constant 0 : index
    %439 = vector.load %arg2[%c0_94, %c0_95] : memref<16x128xf32, #tpu.memory_space<vmem>>, vector<16x128xf32>
    tpu.vector_store %arg2[%c0_94, %c0_95], %438 {strides = array<i32>} : memref<16x128xf32, #tpu.memory_space<vmem>>, vector<16x128xf32>,
    return
  }
}

</mosaic_0001>

<bundles_post_ra>
// kernel: tpu_custom_call.1
= control target key start
LH: loop header
LB: loop body
LE: loop exit
PB: predicated region body
PF: predicated region fallthrough
CT: control target
= control target key end

     0   :  { %7 = vsyncpa [#allocation3], 0  ;;  %s2283_s0 = inlined_call_operand.hbm [shape: f32[8,16], index: 0, kind: input, shape index: {}]   ;;  %s2284_s1 = inlined_call_operand.hbm [shape: f32[120,128], index: 1, kind: input, shape index: {}]   ;;  %s2285_s2 = inlined_call_operand.hbm [shape: f32[16,128], index: 2, kind: output, shape index: {}]  }
   0x1   :  { %8 = vsyncpa [#allocation6], 0 }
   0x2   :  { %9 = vsyncpa [#allocation4], 0  ;;  %s1873_s9 = smov [#allocation2]   ;;  %s1874_s11 = smov [#allocation5]  }
   0x3   :  { %s16_s10 = sshll.u32 %s1873_s9, 4  ;;  %s25_s12 = sshll.u32 %s1874_s11, 4  ;;  %s17_s10 = int_to_ptr.vmem [resolvable:$true] %s16_s10  ;;  %s1899_s12 = int_to_ptr.vmem [resolvable:$true] %s25_s12 }
   0x4   :  { %s1801_s15 = scalar_lea.hbm %s2283_s0, 128 }
   0x5   :  { %p1802_p0 = scmp.ne.s32.totalorder %s2283_s0, %s1801_s15  ;;  %p1805_p1 = scmp.lt.u32.totalorder %s1801_s15, %s2283_s0 }
   0x7   :  { %p1807_p2 = pnand %p1805_p1, %p1802_p0 }
   0x9   :  { %1810 = shalt.err (!%p1807_p2)
}
   0xa   :  { %s1811_s20 = scalar_lea.vmem %s17_s10, 128  ;;  %p1816_p4 = scmp.lt.s32.totalorder %s17_s10, %s17_s10 }
   0xb   :  { %p1812_p3 = scmp.ne.s32.totalorder %s17_s10, %s1811_s20  ;;  %p1817_p5 = scmp.lt.s32.totalorder %s1811_s20, %s1811_s20 }
   0xd   :  { %p1818_p6 = por %p1817_p5, %p1816_p4 }
   0xf   :  { %p1819_p7 = pnand %p1818_p6, %p1812_p3 }
  0x11   :  { %1822 = shalt.err (!%p1819_p7)
}
  0x12   :  { %19 = dma.hbm_to_vmem [thread:$0]  %s2283_s0, 128, %s17_s10, [#allocation3]  }
  0x13   :  { %s1823_s25 = scalar_lea.hbm %s2284_s1, 1920 }
  0x14   :  { %p1824_p8 = scmp.ne.s32.totalorder %s2284_s1, %s1823_s25  ;;  %p1827_p9 = scmp.lt.u32.totalorder %s1823_s25, %s2284_s1 }
  0x16   :  { %p1829_p10 = pnand %p1827_p9, %p1824_p8 }
  0x18   :  { %1832 = shalt.err (!%p1829_p10)
}
  0x19   :  { %s1833_s30 = scalar_lea.vmem %s1899_s12, 1920  ;;  %p1838_p12 = scmp.lt.s32.totalorder %s1899_s12, %s1899_s12 }
  0x1a   :  { %p1834_p11 = scmp.ne.s32.totalorder %s1899_s12, %s1833_s30  ;;  %p1839_p13 = scmp.lt.s32.totalorder %s1833_s30, %s1833_s30 }
  0x1c   :  { %p1840_p0 = por %p1839_p13, %p1838_p12 }
  0x1e   :  { %p1841_p1 = pnand %p1840_p0, %p1834_p11 }
  0x20   :  { %1844 = shalt.err (!%p1841_p1)
}
  0x21   :  { %s1875_s0 = smov 128   ;;  %s1876_s3 = smov 8  }
  0x22   :  { %31 = dma.hbm_to_vmem [thread:$0]  %s2284_s1, 1920, %s1899_s12, [#allocation6], %s1875_s0, %s1875_s0, %s1876_s3  }
  0x23   :  { %1867 = dma.done.wait [#allocation3], 128  }
  0x24   :  { %1868 = vsyncadd [#allocation3], 4294967168 }
  0x25   :  { %1869 = dma.done.wait [#allocation6], 1920  }
  0x26   :  { %1870 = vsyncadd [#allocation6], 4294965376  ;;  %v1877_v0 = vmov 0.0|0.0   ;;  %vm1878_vm0 = vmmov 0   ;;  %v1879_v1 = vmov 0.0   ;;  %v38_v2 = vld [vmem:[#allocation5] sm:$0xff] }
  0x27   :  { %1682 = vmatprep.subr.bf16.mxu1 %v1877_v0  ;;  %1573 = vmatprep.mubr.msk.f32.mxu1 %vm1878_vm0, %v1879_v1  ;;  %v39_v3 = vld [vmem:[#allocation5 + $0x8] sm:$0xff]  ;;  %v40_v5 = vld [vmem:[#allocation5 + $0x10] sm:$0xff]  ;;  %v41_v6 = vld [vmem:[#allocation5 + $0x18] sm:$0xff]  ;;  %vm61_vm1 = vcmask 130048   ;;  %vm209_vm2 = vcmask 261120   ;;  %s1880_s1 = smov 64  }
  0x28   :  { %1688 = vmatprep.subr.bf16.mxu0 %v1877_v0  ;;  %1591 = vmatprep.mubr.msk.f32.mxu0 %vm1878_vm0, %v1879_v1  ;;  %v1683_v4 = vpack.c.bf16 %v39_v3, %v38_v2  ;;  %v42_v7 = vld [vmem:[#allocation5 + $0x20] sm:$0xff]  ;;  %v43_v8 = vld [vmem:[#allocation5 + $0x28] sm:$0xff]  ;;  %v44_v9 = vld [vmem:[#allocation5 + $0x30] sm:$0xff]  ;;  %v1686_v12 = vpack.c.bf16 %v41_v6, %v40_v5  ;;  %s1881_s6 = smov 32   ;;  %vm1219_vm4 = vcmask 46080   ;;  %vm1121_vm6 = vcmask 1040384  }
  0x29   :  { %v45_v10 = vld [vmem:[#allocation5 + $0x38] sm:$0xff]  ;;  %v1939_v13 = vpack.c.bf16 %v43_v8, %v42_v7  ;;  %v53_v15 = vld [vmem:[#allocation5 + $0x71] sm:$0x1]  ;;  %v1489_v17 = vld [vmem:[#allocation5 + $0x70] ss:$0 sm:$0xff]  ;;  %vm1123_vm7 = vcmask 1041408  }
  0x2a   :  { %1684 = vmatpush3.bf16.msra.mxu1 %v1683_v4  ;;  %v56_v11 = vld [vmem:[#allocation2] sm:$0xff]  ;;  %v1943_v14 = vpack.c.bf16 %v45_v10, %v44_v9  ;;  %v54_v39 = vld [vmem:[#allocation5 + $0x72] sm:$0x1]  ;;  %vm1125_vm8 = vcmask 1042432   ;;  %vm1127_vm9 = vcmask 1043456   ;;  %vm1129_vm10 = vcmask 1044480  }
  0x2b   :  { %1685 = vmatprep.subr.bf16.mxu1 %v1877_v0  ;;  %1690 = vmatpush3.bf16.msra.mxu0 %v1939_v13  ;;  %vm1131_vm11 = vcmask 1045504   ;;  %vm1133_vm12 = vcmask 1046528   ;;  %s1883_s7 = smov [#allocation7]  }
  0x2c   :  { %1691 = vmatprep.subr.bf16.mxu0 %v1877_v0  ;;  %s1476_s8 = sshll.u32 %s1883_s7, 4  ;;  %s1477_s8 = int_to_ptr.vmem [resolvable:$true] %s1476_s8 }
  0x2d   :  { %1574 = vmatmul.mubr.msk.f32.vlgmr.msra.gmra.mrb[0].mxu1 %vm61_vm1, %v56_v11  ;;  %s1845_s9 = scalar_lea.vmem %s1477_s8, 256  ;;  %p1850_p3 = scmp.lt.s32.totalorder %s1477_s8, %s1477_s8 }
  0x2e   :  { %1687 = vmatpush3.bf16.msra.mxu1 %v1686_v12  ;;  %1580 = vmatprep.mubr.msk.f32.mxu1 %vm1878_vm0, %v1879_v1  ;;  %p1846_p2 = scmp.ne.s32.totalorder %s1477_s8, %s1845_s9  ;;  %p1851_p4 = scmp.lt.s32.totalorder %s1845_s9, %s1845_s9 }
  0x2f   :  { %1694 = vmatprep.subr.bf16.mxu1 %v1877_v0  ;;  %1693 = vmatpush3.bf16.msra.mxu0 %v1943_v14 }
  0x30   :  { %1700 = vmatprep.subr.bf16.mxu0 %v1877_v0  ;;  %p1852_p5 = por %p1851_p4, %p1850_p3 }
  0x31   :  { %1581 = vmatmul.mubr.msk.f32.vlgmr.msra.gmra.mrb[2].mxu1 %vm61_vm1, %v56_v11  ;;  %vm1375_vm1 = vcmask 48135  }
  0x32   :  { %1696 = vmatpush3.bf16.msra.mxu1 %v1939_v13  ;;  %1602 = vmatprep.mubr.msk.f32.mxu1 %vm1878_vm0, %v1879_v1  ;;  %p1853_p6 = pnand %p1852_p5, %p1846_p2 }
  0x33   :  { %1592 = vmatmul.mubr.msk.f32.vlgmr.msra.gmra.mrb[0].mxu0 %vm209_vm2, %v53_v15  ;;  %1697 = vmatprep.subr.bf16.mxu1 %v1877_v0 }
  0x34   :  { %1702 = vmatpush3.bf16.msra.mxu0 %v1939_v13  ;;  %1613 = vmatprep.mubr.msk.f32.mxu0 %vm1878_vm0, %v1879_v1 }
  0x35   :  { %1703 = vmatprep.subr.bf16.mxu0 %v1877_v0 }
  0x36   :  { %1699 = vmatpush3.bf16.msra.mxu1 %v1943_v14 }
  0x37   :  { %1706 = vmatprep.subr.bf16.mxu1 %v1877_v0 }
  0x38   :  { %1705 = vmatpush3.bf16.msra.mxu0 %v1943_v14 }
  0x39   :  { %1712 = vmatprep.subr.bf16.mxu0 %v1877_v0 }
 0x100   :  { %v131_v16 = vpop.f32.mrb[0].mxu1 }
 0x101   :  { %v1575_v18 = vpop.f32.mrb[1].mxu1  ;;  %v132_v19 = vadd.f32 %v1489_v17, %v131_v16 }
 0x104   :  { %v201_v20 = vpop.f32.mrb[2].mxu1 }
 0x105   :  { %v313_v21 = vrot.slane %v201_v20, 5  ;;  %v423_v22 = vrot.slane %v201_v20, 3  ;;  %v534_v23 = vrot.slane %v201_v20, 1  ;;  %v1582_v24 = vpop.f32.mrb[3].mxu1  ;;  %v206_v25 = vrot.slane %v201_v20, 7 }
 0x106   :  { %v279_v26 = vpop.f32.mrb[0].mxu0 }
 0x107   :  { %v1964_v27 = vadd.f32 %v206_v25, %v132_v19  ;;  %v1593_v28 = vpop.f32.mrb[1].mxu0  ;;  %v1966_v29 = vadd.f32 %v313_v21, %v132_v19  ;;  %v1968_v30 = vadd.f32 %v423_v22, %v132_v19  ;;  %v1970_v31 = vadd.f32 %v534_v23, %v132_v19 }
 0x109   :  { %v283_v32 = vadd.f32 %v279_v26, %v1964_v27 }
 0x10b   :  { %v1493_v33 = vmul.f32 -1.442695, %v283_v32 }
 0x10d   :  { %1753 = vpow2.f32 %v1493_v33 }
 0x117   :  { %v1754_v34 = vpop.eup %1753 }
 0x118   :  { %v287_v35 = vadd.f32 1.0, %v1754_v34 }
 0x11a   :  { %1755 = vrcp.f32 %v287_v35 }
 0x124   :  { %v1756_v36 = vpop.eup %1755 }
 0x125   :  { %v290_v37 = vmul.f32 2.0, %v1756_v36 }
 0x127   :  { %v1494_v38 = vadd.f32 -1.0, %v290_v37 }
 0x129   :  { %298 = vrot.lane.b32.xlu0 %v1494_v38, %s1880_s1 }
 0x12d   :  { %293 = vrot.lane.b32.xlu0 %v54_v39, %s1881_s6 }
 0x19b   :  { %v299_v40 = vpop.permute.xlu0 %298 }
 0x19c   :  { %v301_v41 = vmul.f32 %v1756_v36, %v299_v40 }
 0x19e   :  { %303 = vrot.lane.b32.xlu1 %v301_v41, %s1881_s6 }
 0x19f   :  { %v294_v42 = vpop.permute.xlu0 %293 }
 0x1a0   :  { %v296_v43 = vmul.f32 %v1756_v36, %v294_v42 }
 0x210   :  { %v304_v44 = vpop.permute.xlu1 %303 }
 0x211   :  { %v306_v45 = vadd.f32 %v304_v44, %v296_v43 }
 0x213   :  { %1757 = vtanh.f32 %v306_v45  ;;  %v404_v62 = vrot.slane %v306_v45, 7 }
 0x21d   :  { %v1758_v46 = vpop.eup %1757 }
 0x21e   :  { %309 = vrot.lane.b32.xlu1 %v1758_v46, %s1880_s1 }
 0x290   :  { %v310_v47 = vpop.permute.xlu1 %309 }
 0x291   :  { %v312_v48 = vmul.f32 %v1756_v36, %v310_v47 }
 0x293   :  { %317 = vrot.lane.b32.xlu0 %v312_v48, %s1881_s6 }
 0x305   :  { %v1978_v49 = vpop.permute.xlu0 %317 }
 0x306   :  { %1603 = vmatmul.mubr.msk.f32.vlgmr.msra.gmra.mrb[4].mxu1 %vm209_vm2, %v1978_v49 }
 0x307   :  { %1708 = vmatpush3.bf16.msra.mxu1 %v1939_v13  ;;  %1624 = vmatprep.mubr.msk.f32.mxu1 %vm1878_vm0, %v1879_v1 }
 0x308   :  { %1709 = vmatprep.subr.bf16.mxu1 %v1877_v0 }
 0x30b   :  { %1711 = vmatpush3.bf16.msra.mxu1 %v1943_v14 }
 0x30c   :  { %1718 = vmatprep.subr.bf16.mxu1 %v1877_v0 }
 0x3d9   :  { %v387_v50 = vpop.f32.mrb[4].mxu1 }
 0x3da   :  { %v392_v51 = vrot.slane %v387_v50, 7  ;;  %v1604_v52 = vpop.f32.mrb[5].mxu1 }
 0x3dc   :  { %v394_v53 = vadd.f32 %v392_v51, %v1966_v29 }
 0x3de   :  { %v1496_v54 = vmul.f32 -1.442695, %v394_v53 }
 0x3e0   :  { %1759 = vpow2.f32 %v1496_v54 }
 0x3ea   :  { %v1760_v55 = vpop.eup %1759 }
 0x3eb   :  { %v398_v56 = vadd.f32 1.0, %v1760_v55 }
 0x3ed   :  { %1761 = vrcp.f32 %v398_v56 }
 0x3f7   :  { %v1762_v57 = vpop.eup %1761 }
 0x3f8   :  { %v401_v58 = vmul.f32 2.0, %v1762_v57  ;;  %v406_v63 = vmul.f32 %v1762_v57, %v404_v62 }
 0x3fa   :  { %v1497_v59 = vadd.f32 -1.0, %v401_v58 }
 0x3fc   :  { %408 = vrot.lane.b32.xlu1 %v1497_v59, %s1880_s1 }
 0x46e   :  { %v409_v60 = vpop.permute.xlu1 %408 }
 0x46f   :  { %v411_v61 = vmul.f32 %v1762_v57, %v409_v60 }
 0x471   :  { %413 = vrot.lane.b32.xlu0 %v411_v61, %s1881_s6 }
 0x4e3   :  { %v414_v2 = vpop.permute.xlu0 %413 }
 0x4e4   :  { %v416_v3 = vadd.f32 %v414_v2, %v406_v63 }
 0x4e6   :  { %1763 = vtanh.f32 %v416_v3  ;;  %v515_v23 = vrot.slane %v416_v3, 7 }
 0x4f0   :  { %v1764_v4 = vpop.eup %1763 }
 0x4f1   :  { %419 = vrot.lane.b32.xlu1 %v1764_v4, %s1880_s1 }
 0x563   :  { %v420_v5 = vpop.permute.xlu1 %419 }
 0x564   :  { %v422_v6 = vmul.f32 %v1762_v57, %v420_v5 }
 0x566   :  { %v427_v7 = vrot.slane %v422_v6, 1 }
 0x568   :  { %428 = vrot.lane.b32.xlu0 %v427_v7, %s1881_s6 }
 0x5da   :  { %v1993_v8 = vpop.permute.xlu0 %428 }
 0x5db   :  { %1614 = vmatmul.mubr.msk.f32.vlgmr.msra.gmra.mrb[2].mxu0 %vm209_vm2, %v1993_v8 }
 0x5dc   :  { %1714 = vmatpush3.bf16.msra.mxu0 %v1939_v13  ;;  %1635 = vmatprep.mubr.msk.f32.mxu0 %vm1878_vm0, %v1879_v1 }
 0x5dd   :  { %1715 = vmatprep.subr.bf16.mxu0 %v1877_v0 }
 0x5e0   :  { %1717 = vmatpush3.bf16.msra.mxu0 %v1943_v14 }
 0x5e1   :  { %1724 = vmatprep.subr.bf16.mxu0 %v1877_v0 }
 0x6ae   :  { %v498_v9 = vpop.f32.mrb[2].mxu0 }
 0x6af   :  { %v503_v10 = vrot.slane %v498_v9, 6  ;;  %v1615_v11 = vpop.f32.mrb[3].mxu0 }
 0x6b1   :  { %v505_v12 = vadd.f32 %v503_v10, %v1968_v30 }
 0x6b3   :  { %v1499_v15 = vmul.f32 -1.442695, %v505_v12 }
 0x6b5   :  { %1765 = vpow2.f32 %v1499_v15 }
 0x6bf   :  { %v1766_v16 = vpop.eup %1765 }
 0x6c0   :  { %v509_v17 = vadd.f32 1.0, %v1766_v16 }
 0x6c2   :  { %1767 = vrcp.f32 %v509_v17 }
 0x6cc   :  { %v1768_v18 = vpop.eup %1767 }
 0x6cd   :  { %v512_v19 = vmul.f32 2.0, %v1768_v18  ;;  %v517_v24 = vmul.f32 %v1768_v18, %v515_v23 }
 0x6cf   :  { %v1500_v20 = vadd.f32 -1.0, %v512_v19 }
 0x6d1   :  { %519 = vrot.lane.b32.xlu1 %v1500_v20, %s1880_s1 }
 0x743   :  { %v520_v21 = vpop.permute.xlu1 %519 }
 0x744   :  { %v522_v22 = vmul.f32 %v1768_v18, %v520_v21 }
 0x746   :  { %524 = vrot.lane.b32.xlu0 %v522_v22, %s1881_s6 }
 0x7b8   :  { %v525_v25 = vpop.permute.xlu0 %524 }
 0x7b9   :  { %v527_v26 = vadd.f32 %v525_v25, %v517_v24 }
 0x7bb   :  { %1769 = vtanh.f32 %v527_v26  ;;  %v626_v48 = vrot.slane %v527_v26, 7 }
 0x7c5   :  { %v1770_v28 = vpop.eup %1769 }
 0x7c6   :  { %530 = vrot.lane.b32.xlu1 %v1770_v28, %s1880_s1 }
 0x838   :  { %v531_v32 = vpop.permute.xlu1 %530 }
 0x839   :  { %v533_v33 = vmul.f32 %v1768_v18, %v531_v32 }
 0x83b   :  { %v538_v34 = vrot.slane %v533_v33, 2 }
 0x83d   :  { %539 = vrot.lane.b32.xlu0 %v538_v34, %s1881_s6 }
 0x8af   :  { %v2008_v35 = vpop.permute.xlu0 %539 }
 0x8b0   :  { %1625 = vmatmul.mubr.msk.f32.vlgmr.msra.gmra.mrb[6].mxu1 %vm209_vm2, %v2008_v35 }
 0x8b1   :  { %1720 = vmatpush3.bf16.msra.mxu1 %v1939_v13  ;;  %1646 = vmatprep.mubr.msk.f32.mxu1 %vm1878_vm0, %v1879_v1 }
 0x8b2   :  { %1721 = vmatprep.subr.bf16.mxu1 %v1877_v0 }
 0x8b5   :  { %1723 = vmatpush3.bf16.msra.mxu1 %v1943_v14 }
 0x8b6   :  { %1730 = vmatprep.subr.bf16.mxu1 %v1877_v0 }
 0x983   :  { %v609_v36 = vpop.f32.mrb[6].mxu1 }
 0x984   :  { %v614_v37 = vrot.slane %v609_v36, 5  ;;  %v1626_v38 = vpop.f32.mrb[7].mxu1 }
 0x986   :  { %v616_v39 = vadd.f32 %v614_v37, %v1970_v31 }
 0x988   :  { %v1502_v40 = vmul.f32 -1.442695, %v616_v39 }
 0x98a   :  { %1771 = vpow2.f32 %v1502_v40 }
 0x994   :  { %v1772_v41 = vpop.eup %1771 }
 0x995   :  { %v620_v42 = vadd.f32 1.0, %v1772_v41 }
 0x997   :  { %1773 = vrcp.f32 %v620_v42 }
 0x9a1   :  { %v1774_v43 = vpop.eup %1773 }
 0x9a2   :  { %v623_v44 = vmul.f32 2.0, %v1774_v43  ;;  %v628_v50 = vmul.f32 %v1774_v43, %v626_v48 }
 0x9a4   :  { %v1503_v45 = vadd.f32 -1.0, %v623_v44 }
 0x9a6   :  { %630 = vrot.lane.b32.xlu1 %v1503_v45, %s1880_s1 }
 0xa18   :  { %v631_v46 = vpop.permute.xlu1 %630 }
 0xa19   :  { %v633_v47 = vmul.f32 %v1774_v43, %v631_v46 }
 0xa1b   :  { %635 = vrot.lane.b32.xlu0 %v633_v47, %s1881_s6 }
 0xa8d   :  { %v636_v51 = vpop.permute.xlu0 %635 }
 0xa8e   :  { %v638_v52 = vadd.f32 %v636_v51, %v628_v50 }
 0xa90   :  { %1775 = vtanh.f32 %v638_v52  ;;  %v734_v9 = vrot.slane %v638_v52, 7 }
 0xa9a   :  { %v1776_v53 = vpop.eup %1775 }
 0xa9b   :  { %641 = vrot.lane.b32.xlu1 %v1776_v53, %s1880_s1 }
 0xb0d   :  { %v642_v54 = vpop.permute.xlu1 %641 }
 0xb0e   :  { %v644_v55 = vmul.f32 %v1774_v43, %v642_v54 }
 0xb10   :  { %v646_v56 = vrot.slane %v644_v55, 3 }
 0xb12   :  { %647 = vrot.lane.b32.xlu0 %v646_v56, %s1881_s6 }
 0xb84   :  { %v2023_v57 = vpop.permute.xlu0 %647 }
 0xb85   :  { %1636 = vmatmul.mubr.msk.f32.vlgmr.msra.gmra.mrb[4].mxu0 %vm209_vm2, %v2023_v57 }
 0xb86   :  { %1726 = vmatpush3.bf16.msra.mxu0 %v1939_v13  ;;  %1657 = vmatprep.mubr.msk.f32.mxu0 %vm1878_vm0, %v1879_v1 }
 0xb87   :  { %1727 = vmatprep.subr.bf16.mxu0 %v1877_v0 }
 0xb8a   :  { %1729 = vmatpush3.bf16.msra.mxu0 %v1943_v14 }
 0xb8b   :  { %1736 = vmatprep.subr.bf16.mxu0 %v1877_v0 }
 0xc58   :  { %v717_v58 = vpop.f32.mrb[4].mxu0 }
 0xc59   :  { %v722_v59 = vrot.slane %v717_v58, 4  ;;  %v1637_v60 = vpop.f32.mrb[5].mxu0 }
 0xc5b   :  { %v724_v61 = vadd.f32 %v722_v59, %v1964_v27 }
 0xc5d   :  { %v1505_v62 = vmul.f32 -1.442695, %v724_v61 }
 0xc5f   :  { %1777 = vpow2.f32 %v1505_v62 }
 0xc69   :  { %v1778_v63 = vpop.eup %1777 }
 0xc6a   :  { %v728_v2 = vadd.f32 1.0, %v1778_v63 }
 0xc6c   :  { %1779 = vrcp.f32 %v728_v2 }
 0xc76   :  { %v1780_v3 = vpop.eup %1779 }
 0xc77   :  { %v731_v4 = vmul.f32 2.0, %v1780_v3  ;;  %v736_v10 = vmul.f32 %v1780_v3, %v734_v9 }
 0xc79   :  { %v1506_v5 = vadd.f32 -1.0, %v731_v4 }
 0xc7b   :  { %738 = vrot.lane.b32.xlu1 %v1506_v5, %s1880_s1 }
 0xced   :  { %v739_v6 = vpop.permute.xlu1 %738 }
 0xcee   :  { %v741_v7 = vmul.f32 %v1780_v3, %v739_v6 }
 0xcf0   :  { %743 = vrot.lane.b32.xlu0 %v741_v7, %s1881_s6 }
 0xd62   :  { %v744_v11 = vpop.permute.xlu0 %743 }
 0xd63   :  { %v746_v12 = vadd.f32 %v744_v11, %v736_v10 }
 0xd65   :  { %1781 = vtanh.f32 %v746_v12 }
 0xd6f   :  { %v1782_v27 = vpop.eup %1781 }
 0xd70   :  { %749 = vrot.lane.b32.xlu1 %v1782_v27, %s1880_s1 }
 0xde2   :  { %v750_v15 = vpop.permute.xlu1 %749 }
 0xde3   :  { %v752_v16 = vmul.f32 %v1780_v3, %v750_v15 }
 0xde5   :  { %v754_v17 = vrot.slane %v752_v16, 4 }
 0xde7   :  { %755 = vrot.lane.b32.xlu0 %v754_v17, %s1881_s6 }
 0xe59   :  { %v2038_v18 = vpop.permute.xlu0 %755 }
 0xe5a   :  { %1647 = vmatmul.mubr.msk.f32.vlgmr.msra.gmra.mrb[8].mxu1 %vm209_vm2, %v2038_v18 }
 0xe5b   :  { %1732 = vmatpush3.bf16.msra.mxu1 %v1939_v13  ;;  %1668 = vmatprep.mubr.msk.f32.mxu1 %vm1878_vm0, %v1879_v1 }
 0xe5c   :  { %1733 = vmatprep.subr.bf16.mxu1 %v1877_v0 }
 0xe5f   :  { %1735 = vmatpush3.bf16.msra.mxu1 %v1943_v14  ;;  %v842_v14 = vrot.slane %v746_v12, 7 }
 0xf2d   :  { %v825_v19 = vpop.f32.mrb[8].mxu1 }
 0xf2e   :  { %v830_v20 = vrot.slane %v825_v19, 3  ;;  %v1648_v21 = vpop.f32.mrb[9].mxu1 }
 0xf2f   :  { %v47_v21 = vld [vmem:[#allocation5 + $0x48] sm:$0xff] }
 0xf30   :  { %v832_v22 = vadd.f32 %v830_v20, %v1966_v29  ;;  %v46_v20 = vld [vmem:[#allocation5 + $0x40] sm:$0xff] }
 0xf32   :  { %v1508_v23 = vmul.f32 -1.442695, %v832_v22  ;;  %v1737_v22 = vpack.c.bf16 %v47_v21, %v46_v20 }
 0xf34   :  { %1783 = vpow2.f32 %v1508_v23  ;;  %v1077_v23 = vlaneseq }
 0xf3e   :  { %v1784_v24 = vpop.eup %1783 }
 0xf3f   :  { %v836_v25 = vadd.f32 1.0, %v1784_v24  ;;  %v48_v24 = vld [vmem:[#allocation5 + $0x50] sm:$0xff] }
 0xf41   :  { %1785 = vrcp.f32 %v836_v25  ;;  %v49_v25 = vld [vmem:[#allocation5 + $0x58] sm:$0xff] }
 0xf4b   :  { %v1786_v26 = vpop.eup %1785 }
 0xf4c   :  { %v839_v28 = vmul.f32 2.0, %v1786_v26  ;;  %v844_v34 = vmul.f32 %v1786_v26, %v842_v14  ;;  %v2077_v14 = vld [vmem:[#allocation5 + $0x60] sm:$0x3f] }
 0xf4e   :  { %v1509_v13 = vadd.f32 -1.0, %v839_v28  ;;  %v2072_v28 = vand.u32 127, %v1077_v23 }
 0xf50   :  { %846 = vrot.lane.b32.xlu1 %v1509_v13, %s1880_s1  ;;  %vm1079_vm5 = vcmp.lt.s32.totalorder %v2072_v28, 16 }
 0xfc2   :  { %v847_v32 = vpop.permute.xlu1 %846 }
 0xfc3   :  { %v849_v33 = vmul.f32 %v1786_v26, %v847_v32  ;;  %v2075_v32 = vcvt.s32.f32 %v2072_v28 }
 0xfc5   :  { %851 = vrot.lane.b32.xlu0 %v849_v33, %s1881_s6  ;;  %vm1216_vm3 = vcmp.eq.f32.partialorder %v2075_v32, 5.0 }
0x1037   :  { %v852_v36 = vpop.permute.xlu0 %851 }
0x1038   :  { %v854_v37 = vadd.f32 %v852_v36, %v844_v34  ;;  %v1882_v36 = vmov -10000.0  }
0x103a   :  { %1787 = vtanh.f32 %v854_v37 }
0x1044   :  { %v1788_v29 = vpop.eup %1787 }
0x1045   :  { %857 = vrot.lane.b32.xlu1 %v1788_v29, %s1880_s1 }
0x10b7   :  { %v858_v38 = vpop.permute.xlu1 %857 }
0x10b8   :  { %v860_v39 = vmul.f32 %v1786_v26, %v858_v38  ;;  %v1740_v26 = vpack.c.bf16 %v49_v25, %v48_v24 }
0x10ba   :  { %v862_v40 = vrot.slane %v860_v39, 5 }
0x10bc   :  { %863 = vrot.lane.b32.xlu0 %v862_v40, %s1881_s6  ;;  %v1095_v40 = vsel %vm1079_vm5, %v2023_v57, %v2038_v18 }
0x112e   :  { %v2052_v41 = vpop.permute.xlu0 %863 }
0x112f   :  { %1658 = vmatmul.mubr.msk.f32.vlgmr.msra.gmra.mrb[6].mxu0 %vm209_vm2, %v2052_v41  ;;  %v1092_v39 = vsel %vm1079_vm5, %v2008_v35, %v2052_v41 }
0x1130   :  { %1679 = vmatprep.mubr.msk.f32.mxu0 %vm1878_vm0, %v1879_v1  ;;  %v950_v1 = vrot.slane %v854_v37, 7  ;;  %1738 = vmatpush3.bf16.msra.mxu0 %v1737_v22  ;;  %v1217_v37 = vsel %vm1216_vm3, 0.0, %v1882_v36 }
0x1131   :  { %1739 = vmatprep.subr.bf16.mxu0 %v1877_v0  ;;  %v2081_v0 = vadd.f32 %v1217_v37, %v2077_v14 }
0x1133   :  { %v1220_v29 = vsel %vm1219_vm4, %v2081_v0, -inf }
0x1134   :  { %1741 = vmatpush3.bf16.msra.mxu0 %v1740_v26 }
0x1202   :  { %v933_v42 = vpop.f32.mrb[6].mxu0 }
0x1203   :  { %v938_v43 = vrot.slane %v933_v42, 2  ;;  %v1659_v44 = vpop.f32.mrb[7].mxu0  ;;  %v1096_v42 = vsel %vm1079_vm5, %v2038_v18, %v2023_v57 }
0x1205   :  { %v940_v45 = vadd.f32 %v938_v43, %v1968_v30 }
0x1207   :  { %v1511_v46 = vmul.f32 -1.442695, %v940_v45  ;;  %v1097_v45 = vsel %vm1079_vm5, %v2052_v41, %v2008_v35 }
0x1209   :  { %1789 = vpow2.f32 %v1511_v46  ;;  %v1104_v46 = vrot.slane %v1092_v39, 6 }
0x1213   :  { %v1790_v47 = vpop.eup %1789 }
0x1214   :  { %v944_v48 = vadd.f32 1.0, %v1790_v47 }
0x1216   :  { %1791 = vrcp.f32 %v944_v48  ;;  %v1107_v48 = vrot.slane %v1095_v40, 5 }
0x1220   :  { %v1792_v50 = vpop.eup %1791 }
0x1221   :  { %v947_v51 = vmul.f32 2.0, %v1792_v50  ;;  %v952_v55 = vmul.f32 %v1792_v50, %v950_v1 }
0x1223   :  { %v1512_v52 = vadd.f32 -1.0, %v947_v51  ;;  %v1113_v51 = vrot.slane %v1097_v45, 3 }
0x1225   :  { %954 = vrot.lane.b32.xlu1 %v1512_v52, %s1880_s1 }
0x1297   :  { %v955_v53 = vpop.permute.xlu1 %954 }
0x1298   :  { %v957_v54 = vmul.f32 %v1792_v50, %v955_v53 }
0x129a   :  { %959 = vrot.lane.b32.xlu0 %v957_v54, %s1881_s6 }
0x130c   :  { %v960_v56 = vpop.permute.xlu0 %959 }
0x130d   :  { %v962_v58 = vadd.f32 %v960_v56, %v952_v55 }
0x130f   :  { %1793 = vtanh.f32 %v962_v58  ;;  %v1058_v15 = vrot.slane %v962_v58, 7  ;;  %v2120_v58 = vshrl.u32 %v1077_v23, 7 }
0x1319   :  { %v1794_v30 = vpop.eup %1793 }
0x131a   :  { %965 = vrot.lane.b32.xlu1 %v1794_v30, %s1880_s1  ;;  %v1516_v30 = vld [vmem:[#allocation5 + $0x73] ss:$0 sm:$0xff] }
0x138c   :  { %v966_v59 = vpop.permute.xlu1 %965 }
0x138d   :  { %v968_v60 = vmul.f32 %v1792_v50, %v966_v59  ;;  %v1110_v50 = vrot.slane %v1096_v42, 4  ;;  %v1230_v59 = vsub.s32 0, %v2120_v58 }
0x138f   :  { %v970_v61 = vrot.slane %v968_v60, 6 }
0x1391   :  { %971 = vrot.lane.b32.xlu0 %v970_v61, %s1881_s6 }
0x1403   :  { %v2063_v62 = vpop.permute.xlu0 %971 }
0x1404   :  { %1669 = vmatmul.mubr.msk.f32.vlgmr.msra.gmra.mrb[10].mxu1 %vm209_vm2, %v2063_v62  ;;  %v1089_v38 = vsel %vm1079_vm5, %v1993_v8, %v2063_v62  ;;  %v1098_v57 = vsel %vm1079_vm5, %v2063_v62, %v1993_v8 }
0x1405   :  { %v1101_v43 = vrot.slane %v1089_v38, 7  ;;  %v1116_v53 = vrot.slane %v1098_v57, 2  ;;  %v1295_v38 = vsub.s32 3, %v2120_v58 }
0x14d7   :  { %v1041_v63 = vpop.f32.mrb[10].mxu1 }
0x14d8   :  { %v1046_v2 = vrot.slane %v1041_v63, 1  ;;  %v1670_v3 = vpop.f32.mrb[11].mxu1 }
0x14da   :  { %v1048_v4 = vadd.f32 %v1046_v2, %v1970_v31 }
0x14dc   :  { %v1514_v5 = vmul.f32 -1.442695, %v1048_v4  ;;  %v2131_v4 = vld [vmem:[#allocation5 + $0x68] sm:$0x3f] }
0x14de   :  { %1795 = vpow2.f32 %v1514_v5 }
0x14e8   :  { %v1796_v6 = vpop.eup %1795 }
0x14e9   :  { %v1052_v7 = vadd.f32 1.0, %v1796_v6 }
0x14eb   :  { %1797 = vrcp.f32 %v1052_v7 }
0x14f5   :  { %v1798_v9 = vpop.eup %1797 }
0x14f6   :  { %v1055_v10 = vmul.f32 2.0, %v1798_v9  ;;  %v1060_v16 = vmul.f32 %v1798_v9, %v1058_v15 }
0x14f8   :  { %v1515_v11 = vadd.f32 -1.0, %v1055_v10 }
0x14fa   :  { %1062 = vrot.lane.b32.xlu1 %v1515_v11, %s1880_s1 }
0x156c   :  { %v1063_v12 = vpop.permute.xlu1 %1062 }
0x156d   :  { %v1065_v27 = vmul.f32 %v1798_v9, %v1063_v12 }
0x156f   :  { %1067 = vrot.lane.b32.xlu0 %v1065_v27, %s1881_s6 }
0x15e1   :  { %v1068_v17 = vpop.permute.xlu0 %1067 }
0x15e2   :  { %v1070_v19 = vadd.f32 %v1068_v17, %v1060_v16  ;;  %v1256_v17 = vsub.s32 1, %v2120_v58 }
0x15e4   :  { %1799 = vtanh.f32 %v1070_v19 }
0x15ee   :  { %v1800_v31 = vpop.eup %1799 }
0x15ef   :  { %1073 = vrot.lane.b32.xlu1 %v1800_v31, %s1880_s1 }
0x1613   :  { %1221 = vmax.xlane.f32.xlu1 %v1220_v29 }
0x1661   :  { %v1074_v13 = vpop.permute.xlu1 %1073 }
0x1662   :  { %v1076_v33 = vmul.f32 %v1798_v9, %v1074_v13 }
0x1664   :  { %v1082_v34 = vrot.slane %v1076_v33, 7 }
0x1666   :  { %1083 = vrot.lane.b32.xlu0 %v1082_v34, %s1881_s6 }
0x16a0   :  { %v2129_v3 = vpop.xlane.xlu1 %1221 }
0x16d8   :  { %v1084_v44 = vpop.permute.xlu0 %1083 }
0x16d9   :  { %v1086_v47 = vsel %vm1079_vm5, %v1978_v49, %v1084_v44  ;;  %v1099_v35 = vsel %vm1079_vm5, %v1084_v44, %v1978_v49  ;;  %v1269_v49 = vsub.s32 2, %v2120_v58  ;;  %v1308_v44 = vsub.s32 4, %v2120_v58 }
0x16da   :  { %v1122_v18 = vsel %vm1121_vm6, %v1086_v47, %v1101_v43  ;;  %v1119_v1 = vrot.slane %v1099_v35, 1 }
0x16db   :  { %v1124_v41 = vsel %vm1123_vm7, %v1122_v18, %v1104_v46  ;;  %v1347_v46 = vsub.s32 6, %v2120_v58 }
0x16dc   :  { %v1126_v52 = vsel %vm1125_vm8, %v1124_v41, %v1107_v48 }
0x16dd   :  { %v1128_v54 = vsel %vm1127_vm9, %v1126_v52, %v1110_v50  ;;  %vm1223_vm9 = vcmp.eq.f32.partialorder %v2081_v0, %v2129_v3 }
0x16de   :  { %v1130_v55 = vsel %vm1129_vm10, %v1128_v54, %v1113_v51 }
0x16df   :  { %v1132_v8 = vsel %vm1131_vm11, %v1130_v55, %v1116_v53  ;;  %v1334_v55 = vsub.s32 5, %v2120_v58 }
0x16e0   :  { %v1134_v56 = vsel %vm1133_vm12, %v1132_v8, %v1119_v1  ;;  %vm1404_vm12 = vcmask 48128  }
0x16e1   :  { %1680 = vmatmul.mubr.msk.f32.vlgmr.msra.gmra.mrb[8].mxu0 %vm209_vm2, %v1134_v56 }
0x17b4   :  { %v1208_v60 = vpop.f32.mrb[8].mxu0 }
0x17b5   :  { %v2124_v61 = vadd.f32 %v1516_v30, %v1208_v60  ;;  %v1681_v62 = vpop.f32.mrb[9].mxu0 }
0x17b7   :  { %1469 = vst [vmem:[#allocation7] sm:$0xff] %v2124_v61  ;;  %v1270_v63 = vrot.slane %v2124_v61, %v1269_v49  ;;  %v1231_v2 = vrot.slane %v2124_v61, %v1230_v59  ;;  %v1309_v45 = vrot.slane %v2124_v61, %v1308_v44  ;;  %v1348_v47 = vrot.slane %v2124_v61, %v1347_v46 }
0x17b9   :  { %1272 = vbcast.lane.b32.xlu1 %v1270_v63, 256  ;;  %1233 = vbcast.lane.b32.xlu0 %v1231_v2, 256 }
0x182b   :  { %v1234_v5 = vpop.permute.xlu0 %1233  ;;  %v1273_v22 = vpop.permute.xlu1 %1272 }
0x182c   :  { %v1235_v6 = vadd.f32 %v1234_v5, %v2129_v3 }
0x182e   :  { %v2135_v7 = vadd.f32 %v1235_v6, %v2131_v4 }
0x1830   :  { %v1237_v9 = vsel %vm1219_vm4, %v2135_v7, -inf }
0x1831   :  { %v1238_v10 = vrot.slane %v1237_v9, 4 }
0x1833   :  { %v1239_v11 = vmax.f32 %v1237_v9, %v1238_v10 }
0x1835   :  { %v1240_v12 = vrot.slane %v1239_v11, 2 }
0x1837   :  { %v1241_v27 = vmax.f32 %v1239_v11, %v1240_v12 }
0x1839   :  { %v1242_v15 = vrot.slane %v1241_v27, 1 }
0x183b   :  { %v2139_v16 = vmax.f32 %v1241_v27, %v1242_v15  ;;  %v1372_v27 = vrot.slane %v2077_v14, 5 }
0x183d   :  { %vm1244_vm13 = vcmp.eq.f32.partialorder %v2135_v7, %v2139_v16  ;;  %v1253_v19 = vadd.f32 %v2139_v16, %v2124_v61 }
0x183f   :  { %v1257_v31 = vrot.slane %v1253_v19, %v1256_v17 }
0x1841   :  { %v2147_v20 = vadd.f32 %v1257_v31, %v2077_v14 }
0x1843   :  { %v1259_v21 = vsel %vm1219_vm4, %v2147_v20, -inf }
0x1844   :  { %1260 = vmax.xlane.f32.xlu0 %v1259_v21 }
0x18d1   :  { %v2151_v23 = vpop.xlane.xlu0 %1260 }
0x18d2   :  { %v1274_v24 = vadd.f32 %v1273_v22, %v2151_v23  ;;  %v2196_v22 = vcvt.s32.f32 %v2120_v58  ;;  %vm1262_vm8 = vcmp.eq.f32.partialorder %v2147_v20, %v2151_v23 }
0x18d3   :  { %v1263_v46 = vsel %vm1262_vm8, %v2075_v32, 6.0  ;;  %vm1453_vm8 = vcmp.eq.s32.totalorder %v2072_v28, 4 }
0x18d4   :  { %v2155_v25 = vadd.f32 %v1274_v24, %v2131_v4 }
0x18d6   :  { %v1276_v26 = vsel %vm1219_vm4, %v2155_v25, -inf }
0x18d7   :  { %v1277_v13 = vrot.slane %v1276_v26, 4 }
0x18d9   :  { %v1278_v33 = vmax.f32 %v1276_v26, %v1277_v13 }
0x18db   :  { %v1279_v34 = vrot.slane %v1278_v33, 2 }
0x18dd   :  { %v1280_v36 = vmax.f32 %v1278_v33, %v1279_v34 }
0x18df   :  { %v1281_v37 = vrot.slane %v1280_v36, 1 }
0x18e1   :  { %v2159_v29 = vmax.f32 %v1280_v36, %v1281_v37 }
0x18e3   :  { %vm1283_vm14 = vcmp.eq.f32.partialorder %v2155_v25, %v2159_v29  ;;  %v1292_v39 = vadd.f32 %v2159_v29, %v2124_v61 }
0x18e5   :  { %v1296_v40 = vrot.slane %v1292_v39, %v1295_v38 }
0x18e7   :  { %v2167_v42 = vadd.f32 %v1296_v40, %v2077_v14 }
0x18e9   :  { %v1298_v43 = vsel %vm1219_vm4, %v2167_v42, -inf }
0x18ea   :  { %1299 = vmax.xlane.f32.xlu0 %v1298_v43 }
0x1900   :  { %1311 = vbcast.lane.b32.xlu0 %v1309_v45, 256 }
0x1904   :  { %1350 = vbcast.lane.b32.xlu0 %v1348_v47, 256  ;;  %v1264_v47 = vsel %vm1219_vm4, %v1263_v46, inf }
0x1977   :  { %v1300_v48 = vpop.xlane.xlu0 %1299 }
0x1978   :  { %vm1301_vm7 = vcmp.eq.f32.partialorder %v2167_v42, %v1300_v48  ;;  %v1224_v42 = vsel %vm1223_vm9, %v2075_v32, 6.0  ;;  %vm1455_vm9 = vcmp.eq.s32.totalorder %v2072_v28, 5 }
0x1979   :  { %v1302_v44 = vsel %vm1301_vm7, %v2075_v32, 6.0 }
0x197a   :  { %v1303_v45 = vsel %vm1219_vm4, %v1302_v44, inf }
0x197b   :  { %v1312_v57 = vpop.permute.xlu0 %1311 }
0x197c   :  { %v1313_v18 = vadd.f32 %v1312_v57, %v1300_v48  ;;  %v1225_v48 = vsel %vm1219_vm4, %v1224_v42, inf  ;;  %v1391_v57 = vsub.s32 7, %v2120_v58 }
0x197e   :  { %v2176_v50 = vadd.f32 %v1313_v18, %v2131_v4 }
0x197f   :  { %v1351_v59 = vpop.permute.xlu0 %1350 }
0x1980   :  { %v1315_v35 = vsel %vm1219_vm4, %v2176_v50, -inf }
0x1981   :  { %v1316_v41 = vrot.slane %v1315_v35, 4 }
0x1983   :  { %v1317_v51 = vmax.f32 %v1315_v35, %v1316_v41 }
0x1985   :  { %v1318_v52 = vrot.slane %v1317_v51, 2 }
0x1987   :  { %v1319_v53 = vmax.f32 %v1317_v51, %v1318_v52 }
0x1989   :  { %v1320_v54 = vrot.slane %v1319_v53, 1 }
0x198b   :  { %v1321_v1 = vmax.f32 %v1319_v53, %v1320_v54 }
0x198d   :  { %vm1322_vm15 = vcmp.eq.f32.partialorder %v2176_v50, %v1321_v1  ;;  %v1331_v8 = vadd.f32 %v1321_v1, %v2124_v61 }
0x198e   :  { %v1323_v20 = vsel %vm1322_vm15, %v2196_v22, 6.0 }
0x198f   :  { %v1335_v56 = vrot.slane %v1331_v8, %v1334_v55  ;;  %v1324_v23 = vsel %vm1219_vm4, %v1323_v20, inf }
0x1990   :  { %v1325_v18 = vrot.slane %v1324_v23, 4 }
0x1991   :  { %v1336_v30 = vadd.f32 %v1335_v56, %v2077_v14 }
0x1992   :  { %v1326_v3 = vmin.f32 %v1324_v23, %v1325_v18 }
0x1993   :  { %v1337_v49 = vsel %vm1219_vm4, %v1336_v30, -inf }
0x1994   :  { %1338 = vmax.xlane.f32.xlu1 %v1337_v49  ;;  %v1327_v53 = vrot.slane %v1326_v3, 2 }
0x1996   :  { %v1328_v1 = vmin.f32 %v1326_v3, %v1327_v53 }
0x1998   :  { %v1329_v56 = vrot.slane %v1328_v1, 1 }
0x199a   :  { %v1330_v49 = vmin.f32 %v1328_v1, %v1329_v56 }
0x1a21   :  { %v1339_v60 = vpop.xlane.xlu1 %1338 }
0x1a22   :  { %v1352_v62 = vadd.f32 %v1351_v59, %v1339_v60  ;;  %vm1340_vm3 = vcmp.eq.f32.partialorder %v1336_v30, %v1339_v60 }
0x1a23   :  { %v1341_v40 = vsel %vm1340_vm3, %v2075_v32, 6.0  ;;  %vm1449_vm3 = vcmp.eq.s32.totalorder %v2072_v28, 2 }
0x1a24   :  { %v1353_v63 = vadd.f32 %v1352_v62, %v2131_v4  ;;  %v1342_v43 = vsel %vm1219_vm4, %v1341_v40, inf  ;;  %v1284_v62 = vsel %vm1283_vm14, %v2196_v22, 6.0 }
0x1a26   :  { %v1354_v2 = vsel %vm1219_vm4, %v1353_v63, -inf }
0x1a27   :  { %v1355_v5 = vrot.slane %v1354_v2, 4 }
0x1a29   :  { %v1356_v6 = vmax.f32 %v1354_v2, %v1355_v5 }
0x1a2b   :  { %v1357_v9 = vrot.slane %v1356_v6, 2 }
0x1a2d   :  { %v1358_v10 = vmax.f32 %v1356_v6, %v1357_v9 }
0x1a2f   :  { %v1359_v11 = vrot.slane %v1358_v10, 1 }
0x1a31   :  { %v1360_v12 = vmax.f32 %v1358_v10, %v1359_v11 }
0x1a33   :  { %vm1361_vm0 = vcmp.eq.f32.partialorder %v1353_v63, %v1360_v12  ;;  %v1370_v15 = vadd.f32 %v1360_v12, %v2124_v61  ;;  %v1285_v63 = vsel %vm1219_vm4, %v1284_v62, inf }
0x1a34   :  { %v1362_v14 = vsel %vm1361_vm0, %v2196_v22, 6.0  ;;  %v1286_v2 = vrot.slane %v1285_v63, 4 }
0x1a35   :  { %v1374_v17 = vadd.f32 %v1372_v27, %v1370_v15  ;;  %v1363_v61 = vsel %vm1219_vm4, %v1362_v14, inf }
0x1a36   :  { %v1364_v24 = vrot.slane %v1363_v61, 4  ;;  %v1287_v5 = vmin.f32 %v1285_v63, %v1286_v2 }
0x1a37   :  { %v1376_v19 = vsel %vm1375_vm1, %v1374_v17, -inf }
0x1a38   :  { %1377 = vmax.xlane.f32.xlu0 %v1376_v19  ;;  %v1365_v26 = vmin.f32 %v1363_v61, %v1364_v24  ;;  %v1288_v12 = vrot.slane %v1287_v5, 2 }
0x1a3a   :  { %v1366_v13 = vrot.slane %v1365_v26, 2 }
0x1a3c   :  { %v1367_v33 = vmin.f32 %v1365_v26, %v1366_v13  ;;  %v1245_v26 = vsel %vm1244_vm13, %v2196_v22, 6.0  ;;  %vm1445_vm13 = vcmp.eq.s32.totalorder %v2072_v28, 0 }
0x1a3d   :  { %v1246_v13 = vsel %vm1219_vm4, %v1245_v26, inf }
0x1a3e   :  { %v1368_v34 = vrot.slane %v1367_v33, 1 }
0x1a40   :  { %v1369_v37 = vmin.f32 %v1367_v33, %v1368_v34  ;;  %v1247_v33 = vrot.slane %v1246_v13, 4 }
0x1a42   :  { %v1248_v34 = vmin.f32 %v1246_v13, %v1247_v33 }
0x1ac5   :  { %v2190_v31 = vpop.xlane.xlu0 %1377 }
0x1ac6   :  { %vm1379_vm2 = vcmp.eq.f32.partialorder %v1374_v17, %v2190_v31  ;;  %v1289_v17 = vmin.f32 %v1287_v5, %v1288_v12 }
0x1ac7   :  { %v1380_v4 = vsel %vm1379_vm2, %v2075_v32, 6.0  ;;  %vm1447_vm2 = vcmp.eq.s32.totalorder %v2072_v28, 1 }
0x1ac8   :  { %v1381_v21 = vsel %vm1375_vm1, %v1380_v4, inf }
0x1ac9   :  { %1382 = vmin.xlane.f32.xlu1 %v1381_v21  ;;  %v1290_v21 = vrot.slane %v1289_v17, 1 }
0x1acb   :  { %v1291_v14 = vmin.f32 %v1289_v17, %v1290_v21 }
0x1b56   :  { %v2200_v36 = vpop.xlane.xlu1 %1382 }
0x1b57   :  { %vm1384_vm5 = vcmp.eq.f32.partialorder %v2075_v32, %v2200_v36 }
0x1b58   :  { %v1385_v38 = vsel %vm1384_vm5, %v1369_v37, 0.0  ;;  %vm1451_vm5 = vcmp.eq.s32.totalorder %v2072_v28, 3 }
0x1b59   :  { %v1386_v39 = vsel %vm1375_vm1, %v1385_v38, 0.0 }
0x1b5a   :  { %1387 = vadd.xlane.f32.xlu1 %v1386_v39 }
0x1b5e   :  { %1343 = vmin.xlane.f32.xlu1 %v1342_v43  ;;  %v1249_v43 = vrot.slane %v1248_v34, 2 }
0x1b60   :  { %v1250_v46 = vmin.f32 %v1248_v34, %v1249_v43 }
0x1b62   :  { %1304 = vmin.xlane.f32.xlu1 %v1303_v45 }
0x1b66   :  { %1265 = vmin.xlane.f32.xlu1 %v1264_v47 }
0x1b6a   :  { %1226 = vmin.xlane.f32.xlu1 %v1225_v48  ;;  %v1251_v48 = vrot.slane %v1250_v46, 1 }
0x1b6c   :  { %v1252_v20 = vmin.f32 %v1250_v46, %v1251_v48 }
0x1be7   :  { %v2223_v35 = vpop.xlane.xlu1 %1387 }
0x1be8   :  { %v1392_v0 = vrot.slane %v2223_v35, %v1391_v57 }
0x1bea   :  { %vm1393_vm10 = vcmp.eq.f32.partialorder %v2196_v22, %v1392_v0 }
0x1beb   :  { %v1344_v41 = vpop.xlane.xlu1 %1343 }
0x1bec   :  { %v1394_v51 = vsel %vm1393_vm10, %v1344_v41, 0.0  ;;  %vm1457_vm10 = vcmp.eq.s32.totalorder %v2072_v28, 6 }
0x1bed   :  { %v1395_v52 = vsel %vm1131_vm11, %v1394_v51, 0.0 }
0x1bee   :  { %v1396_v54 = vrot.slane %v1395_v52, 4 }
0x1bef   :  { %v1305_v9 = vpop.xlane.xlu1 %1304 }
0x1bf0   :  { %v1397_v50 = vadd.f32 %v1396_v54, %v1395_v52 }
0x1bf2   :  { %v1398_v55 = vrot.slane %v1397_v50, 2 }
0x1bf3   :  { %v1266_v38 = vpop.xlane.xlu1 %1265 }
0x1bf4   :  { %v1399_v8 = vadd.f32 %v1398_v55, %v1397_v50 }
0x1bf6   :  { %v1400_v58 = vrot.slane %v1399_v8, 1 }
0x1bf7   :  { %v1227_v0 = vpop.xlane.xlu1 %1226 }
0x1bf8   :  { %v2228_v30 = vadd.f32 %v1400_v58, %v1399_v8 }
0x1bfa   :  { %vm1402_vm15 = vcmp.eq.f32.partialorder %v2075_v32, %v2228_v30 }
0x1bfb   :  { %v1403_v59 = vsel %vm1402_vm15, %v1330_v49, 0.0  ;;  %vm1463_vm15 = vcmp.eq.s32.totalorder %v2072_v28, 9 }
0x1bfc   :  { %v1405_v60 = vsel %vm1404_vm12, %v1403_v59, 0.0 }
0x1bfd   :  { %1406 = vadd.xlane.f32.xlu0 %v1405_v60 }
0x1c8a   :  { %v1407_v6 = vpop.xlane.xlu0 %1406 }
0x1c8b   :  { %vm1408_vm0 = vcmp.eq.f32.partialorder %v2196_v22, %v1407_v6 }
0x1c8c   :  { %v1409_v10 = vsel %vm1408_vm0, %v1305_v9, 0.0 }
0x1c8d   :  { %v1410_v11 = vsel %vm1131_vm11, %v1409_v10, 0.0 }
0x1c8e   :  { %v1411_v27 = vrot.slane %v1410_v11, 4 }
0x1c90   :  { %v1412_v15 = vadd.f32 %v1411_v27, %v1410_v11 }
0x1c92   :  { %v1413_v19 = vrot.slane %v1412_v15, 2 }
0x1c94   :  { %v1414_v4 = vadd.f32 %v1413_v19, %v1412_v15 }
0x1c96   :  { %v1415_v25 = vrot.slane %v1414_v4, 1 }
0x1c98   :  { %v1416_v29 = vadd.f32 %v1415_v25, %v1414_v4 }
0x1c9a   :  { %vm1417_vm14 = vcmp.eq.f32.partialorder %v2075_v32, %v1416_v29 }
0x1c9b   :  { %v1418_v61 = vsel %vm1417_vm14, %v1291_v14, 0.0 }
0x1c9c   :  { %v1419_v24 = vsel %vm1404_vm12, %v1418_v61, 0.0 }
0x1c9d   :  { %1420 = vadd.xlane.f32.xlu0 %v1419_v24 }
0x1d2a   :  { %v1421_v37 = vpop.xlane.xlu0 %1420 }
0x1d2b   :  { %vm1422_vm1 = vcmp.eq.f32.partialorder %v2196_v22, %v1421_v37 }
0x1d2c   :  { %v1423_v39 = vsel %vm1422_vm1, %v1266_v38, 0.0 }
0x1d2d   :  { %v1424_v40 = vsel %vm1131_vm11, %v1423_v39, 0.0 }
0x1d2e   :  { %v1425_v44 = vrot.slane %v1424_v40, 4 }
0x1d30   :  { %v1426_v45 = vadd.f32 %v1425_v44, %v1424_v40 }
0x1d32   :  { %v1427_v47 = vrot.slane %v1426_v45, 2 }
0x1d34   :  { %v1428_v42 = vadd.f32 %v1427_v47, %v1426_v45 }
0x1d36   :  { %v1429_v7 = vrot.slane %v1428_v42, 1 }
0x1d38   :  { %v1430_v16 = vadd.f32 %v1429_v7, %v1428_v42 }
0x1d3a   :  { %vm1431_vm4 = vcmp.eq.f32.partialorder %v2075_v32, %v1430_v16 }
0x1d3b   :  { %v1432_v23 = vsel %vm1431_vm4, %v1252_v20, 0.0 }
0x1d3c   :  { %v1433_v57 = vsel %vm1404_vm12, %v1432_v23, 0.0  ;;  %vm1459_vm12 = vcmp.eq.s32.totalorder %v2072_v28, 7 }
0x1d3d   :  { %1434 = vadd.xlane.f32.xlu0 %v1433_v57 }
0x1dca   :  { %v1435_v18 = vpop.xlane.xlu0 %1434 }
0x1dcb   :  { %vm1436_vm7 = vcmp.eq.f32.partialorder %v2196_v22, %v1435_v18  ;;  %v1446_v3 = vsel %vm1445_vm13, %v1435_v18, 0.0 }
0x1dcc   :  { %v1437_v32 = vsel %vm1436_vm7, %v1227_v0, 0.0  ;;  %v1448_v41 = vsel %vm1447_vm2, %v1430_v16, %v1446_v3 }
0x1dcd   :  { %v1438_v51 = vsel %vm1131_vm11, %v1437_v32, 0.0  ;;  %v1450_v52 = vsel %vm1449_vm3, %v1421_v37, %v1448_v41  ;;  %vm1461_vm11 = vcmp.eq.s32.totalorder %v2072_v28, 8 }
0x1dce   :  { %v1439_v53 = vrot.slane %v1438_v51, 4  ;;  %v1452_v54 = vsel %vm1451_vm5, %v1416_v29, %v1450_v52 }
0x1dcf   :  { %v1454_v50 = vsel %vm1453_vm8, %v1407_v6, %v1452_v54 }
0x1dd0   :  { %v1440_v1 = vadd.f32 %v1439_v53, %v1438_v51  ;;  %v1456_v55 = vsel %vm1455_vm9, %v2228_v30, %v1454_v50 }
0x1dd1   :  { %v1458_v22 = vsel %vm1457_vm10, %v2223_v35, %v1456_v55 }
0x1dd2   :  { %v1441_v8 = vrot.slane %v1440_v1, 2  ;;  %v1460_v49 = vsel %vm1459_vm12, %v2200_v36, %v1458_v22 }
0x1dd3   :  { %v1462_v60 = vsel %vm1461_vm11, %v2190_v31, %v1460_v49 }
0x1dd4   :  { %v1442_v56 = vadd.f32 %v1441_v8, %v1440_v1 }
0x1dd6   :  { %v1443_v58 = vrot.slane %v1442_v56, 1 }
0x1dd8   :  { %v1444_v59 = vadd.f32 %v1443_v58, %v1442_v56 }
0x1dda   :  { %v1464_v30 = vsel %vm1463_vm15, %v1444_v59, %v1462_v60 }
0x1ddb   :  { %v1466_v62 = vrot.slane %v1464_v30, 7 }
0x1ddd   :  { %v1468_v35 = vsel %vm1121_vm6, %v1466_v62, 0.0 }
0x1dde   :  { %1470 = vst [vmem:[#allocation7 + $0x8] sm:$0xff] %v1468_v35 }
0x1ddf   :  { %1856 = shalt.err (!%p1853_p6)
}
0x1de0   :  { %s1857_s12 = scalar_lea.hbm %s2285_s2, 256 }
0x1de1   :  { %p1858_p7 = scmp.ne.s32.totalorder %s2285_s2, %s1857_s12  ;;  %p1861_p8 = scmp.lt.u32.totalorder %s1857_s12, %s2285_s2 }
0x1de3   :  { %p1863_p9 = pnand %p1861_p8, %p1858_p7 }
0x1de5   :  { %1866 = shalt.err (!%p1863_p9)
}
0x1de6   :  { %1482 = dma.vmem_to_hbm [thread:$0]  %s1477_s8, 256, %s2285_s2, [#allocation4], %s1875_s0, %s1875_s0, %s1876_s3  }
0x1de7   :  { %1871 = dma.done.wait [#allocation4], 256  }
0x1de8   :  { %1872 = vsyncadd [#allocation4], 4294967040 }
0x1de9   :  { %1486 = vsyncpa [#allocation3], 1 }
0x1dea   :  { %1487 = vsyncpa [#allocation6], 1 }
0x1deb   :  { %1488 = vsyncpa [#allocation4], 1 }

</bundles_post_ra>
